<compile_context>
chip_gen: v7x
topology: tpu7x:2x2x1
jax: 0.10.0
libtpu: 0.0.40
codegen_flags: <defaults>
</compile_context>

<pallas_src>
import functools

import jax
import jax.numpy as jnp
from jax.experimental import pallas as pl
from jax.experimental.pallas import tpu as pltpu

CHN_MID = 32
CHN_IN = 5           # torch module's concatenated feature channels
CHN_IN_EFF = 4       # (d0 - d1) channel folded into the weights on the host
CHN_IN_PAD = 8       # MXU-aligned contraction depth
MAX_TILE = 16384     # pixels (lanes) per grid step
MIN_TILE = 1024      # 8 * 128: keeps the lane dim a multiple of 128

_HIGHEST = jax.lax.Precision.HIGHEST


def _leaky_relu(x, slope=0.2):
    return jnp.where(x > 0, x, slope * x)


def dist2logit_kernel(d01_ref, w1_ref, b1_ref, w2_ref, b2_ref, w3_ref, b3_ref,
                      out_ref, *, eps):
    # d01_ref: (2, T) with rows [d0, d1]; pixels are lane-dense on the last dim.
    d01 = d01_ref[...]
    tile = d01.shape[1]

    d0 = d01[0:1, :]
    d1 = d01[1:2, :]
    r0 = d0 / (d1 + eps)
    r1 = d1 / (d0 + eps)

    # Feature operand built in registers (sublane concatenate) -- no VMEM
    # staging stores, no per-tile zero-fill of padding rows.
    # Channel order matches w1_eff: [d0, d1, d0/(d1+eps), d1/(d0+eps), 0 x4].
    feat = jnp.concatenate(
        [d01, r0, r1,
         jnp.zeros((CHN_IN_PAD - CHN_IN_EFF, tile), jnp.float32)],
        axis=0)                                                   # (8, T)

    # conv1 (1x1, 5->32, folded to 4 real inputs) + LeakyReLU(0.2).
    h = jnp.dot(w1_ref[...], feat,
                preferred_element_type=jnp.float32, precision=_HIGHEST)
    h = _leaky_relu(h + b1_ref[...])

    # conv2 (1x1, 32->32) + LeakyReLU(0.2).
    h = jnp.dot(w2_ref[...], h,
                preferred_element_type=jnp.float32, precision=_HIGHEST)
    h = _leaky_relu(h + b2_ref[...])

    # conv3 (1x1, 32->1) + Sigmoid: broadcast-multiply + sublane reduce
    # (VPU/XLU) instead of a nearly-empty MXU pass with a width-1 result.
    y = jnp.sum(h * w3_ref[...], axis=0, keepdims=True) + b3_ref[...]  # (1, T)
    out_ref[...] = jax.nn.sigmoid(y)


def _choose_tile(n_pixels):
    """Adaptive lane tile: big enough to amortize per-step cost, small enough
    that tiny inputs aren't mostly padding and v7x's two cores both get work."""
    t = -(-n_pixels // 4)                       # aim for >= 4 tiles
    t = -(-t // MIN_TILE) * MIN_TILE            # round up to a multiple of 1024
    return max(MIN_TILE, min(MAX_TILE, t))


def dist2logit_forward(d0, d1, params, eps=0.1):
    """d0, d1: (N, 1, H, W) float32.  Returns (N, 1, H, W) float32 in [0, 1]."""
    w1, b1, w2, b2, w3, b3 = params
    N, C, H, W = d0.shape
    assert C == 1 and d1.shape == d0.shape

    P = N * H * W
    tile = _choose_tile(P)
    n_tiles = pl.cdiv(P, tile)
    P_pad = n_tiles * tile
    pad = P_pad - P

    # Single stacked, lane-dense (2, P_pad) input: rows = [d0, d1].
    d01 = jnp.concatenate([d0.astype(jnp.float32).reshape(1, P),
                           d1.astype(jnp.float32).reshape(1, P)], axis=0)
    d01 = jnp.pad(d01, ((0, 0), (0, pad)))

    # Fold the redundant (d0 - d1) channel into conv1's weights on the host:
    #   w0' = w0 + w2, w1' = w1 - w2; remaining real channels are the ratios.
    # Then zero-pad the contraction dim 4 -> 8 for MXU alignment.
    w1 = w1.astype(jnp.float32)
    w1_eff = jnp.stack([w1[:, 0] + w1[:, 2],
                        w1[:, 1] - w1[:, 2],
                        w1[:, 3],
                        w1[:, 4]], axis=1)                          # (32, 4)
    w1p = jnp.pad(w1_eff, ((0, 0), (0, CHN_IN_PAD - CHN_IN_EFF)))   # (32, 8)

    b1 = b1.astype(jnp.float32)
    w2 = w2.astype(jnp.float32)
    b2 = b2.astype(jnp.float32)
    w3 = w3.astype(jnp.float32)
    b3 = b3.astype(jnp.float32)

    in_spec = pl.BlockSpec((2, tile), lambda i: (0, i))
    out_spec = pl.BlockSpec((1, tile), lambda i: (0, i))
    full = lambda a: pl.BlockSpec(a.shape, lambda i: (0,) * a.ndim)

    out = pl.pallas_call(
        functools.partial(dist2logit_kernel, eps=eps),
        out_shape=jax.ShapeDtypeStruct((1, P_pad), jnp.float32),
        grid=(n_tiles,),
        in_specs=[
            in_spec,                           # stacked d0/d1 pixel tile
            full(w1p), full(b1),               # (32, 8), (32, 1)
            full(w2), full(b2),                # (32, 32), (32, 1)
            full(w3), full(b3),                # (32, 1), (1, 1)
        ],
        out_specs=out_spec,
        compiler_params=pltpu.CompilerParams(
            dimension_semantics=("parallel",),
            vmem_limit_bytes=32 * 1024 * 1024),
    )(d01, w1p, b1, w2, b2, w3, b3)

    return out[0, :P].reshape(N, 1, H, W)


def init_params(key, chn_mid=CHN_MID):
    """Deterministic synthetic weights matching the module's shapes.

    Conv2d(5, 32, 1) weight (32, 5, 1, 1) is stored as (32, 5) = (C_out, C_in),
    conv3 weight (1, 32, 1, 1) as (32, 1), biases as (C_out, 1)."""
    ks = jax.random.split(key, 6)

    def uniform(k, shape, fan_in):
        bound = 1.0 / jnp.sqrt(fan_in)
        return jax.random.uniform(k, shape, jnp.float32, -bound, bound)

    w1 = uniform(ks[0], (chn_mid, CHN_IN), float(CHN_IN))
    b1 = uniform(ks[1], (chn_mid, 1), float(CHN_IN))
    w2 = uniform(ks[2], (chn_mid, chn_mid), float(chn_mid))
    b2 = uniform(ks[3], (chn_mid, 1), float(chn_mid))
    w3 = uniform(ks[4], (chn_mid, 1), float(chn_mid))
    b3 = uniform(ks[5], (1, 1), float(chn_mid))
    return (w1, b1, w2, b2, w3, b3)


def _reference(d0, d1, params, eps=0.1):
    """Pure-JAX NCHW reference (same matmul precision as the kernel)."""
    w1, b1, w2, b2, w3, b3 = params
    x = jnp.concatenate(
        [d0, d1, d0 - d1, d0 / (d1 + eps), d1 / (d0 + eps)], axis=1)  # (N,5,H,W)
    x = jnp.einsum('oc,nchw->nohw', w1, x,
                   precision=_HIGHEST) + b1[:, 0][None, :, None, None]
    x = jnp.where(x > 0, x, 0.2 * x)
    x = jnp.einsum('oc,nchw->nohw', w2, x,
                   precision=_HIGHEST) + b2[:, 0][None, :, None, None]
    x = jnp.where(x > 0, x, 0.2 * x)
    x = jnp.einsum('c,nchw->nhw', w3[:, 0], x,
                   precision=_HIGHEST)[:, None] + b3[0, 0]
    return jax.nn.sigmoid(x)


if __name__ == "__main__":
    key = jax.random.PRNGKey(0)
    kp, k0, k1 = jax.random.split(key, 3)

    N, H, W = 2, 16, 16
    # LPIPS distances are non-negative; use abs of normals.
    d0 = jnp.abs(jax.random.normal(k0, (N, 1, H, W), jnp.float32))
    d1 = jnp.abs(jax.random.normal(k1, (N, 1, H, W), jnp.float32))

    params = init_params(kp)

    out = dist2logit_forward(d0, d1, params)
    out = jax.block_until_ready(out)

    ref = _reference(d0, d1, params)
    assert out.shape == (N, 1, H, W)
    assert jnp.allclose(out, ref, atol=1e-5, rtol=1e-5), "mismatch vs reference"

    print("KERNEL_OK")
</pallas_src>

<mosaic_0001>
module attributes {stable_mosaic.version = 11 : i64} {
  func.func @dist2logit_kernel(%arg0: i32, %arg1: memref<2x1024xf32, #tpu.memory_space<vmem>>, %arg2: memref<32x8xf32, #tpu.memory_space<vmem>>, %arg3: memref<32x1xf32, #tpu.memory_space<vmem>>, %arg4: memref<32x32xf32, #tpu.memory_space<vmem>>, %arg5: memref<32x1xf32, #tpu.memory_space<vmem>>, %arg6: memref<32x1xf32, #tpu.memory_space<vmem>>, %arg7: memref<1x1xf32, #tpu.memory_space<vmem>>, %arg8: memref<1x1024xf32, #tpu.memory_space<vmem>>) attributes {dimension_semantics = [#tpu.dimension_semantics<parallel>], iteration_bounds = array<i64: 1>, scalar_prefetch = 0 : i64, scratch_operands = 0 : i64, tpu.core_type = #tpu.core_type<tc>, window_params = [{transform_indices = @transform_0, window_bounds = array<i64: 2, 1024>}, {pipeline_mode = #tpu.pipeline_mode<synchronous>, transform_indices = @transform_1, window_bounds = array<i64: 32, 8>}, {pipeline_mode = #tpu.pipeline_mode<synchronous>, transform_indices = @transform_2, window_bounds = array<i64: 32, 1>}, {pipeline_mode = #tpu.pipeline_mode<synchronous>, transform_indices = @transform_3, window_bounds = array<i64: 32, 32>}, {pipeline_mode = #tpu.pipeline_mode<synchronous>, transform_indices = @transform_4, window_bounds = array<i64: 32, 1>}, {pipeline_mode = #tpu.pipeline_mode<synchronous>, transform_indices = @transform_5, window_bounds = array<i64: 32, 1>}, {pipeline_mode = #tpu.pipeline_mode<synchronous>, transform_indices = @transform_6, window_bounds = array<i64: 1, 1>}, {transform_indices = @transform_7, window_bounds = array<i64: 1, 1024>}]} {
    %c0 = arith.constant 0 : index
    %c0_0 = arith.constant 0 : index
    %0 = vector.load %arg1[%c0, %c0_0] : memref<2x1024xf32, #tpu.memory_space<vmem>>, vector<2x1024xf32>
    %1 = vector.extract_strided_slice %0 {offsets = [0, 0], sizes = [1, 1024], strides = [1, 1]} : vector<2x1024xf32> to vector<1x1024xf32>
    %2 = vector.extract_strided_slice %0 {offsets = [1, 0], sizes = [1, 1024], strides = [1, 1]} : vector<2x1024xf32> to vector<1x1024xf32>
    %cst = arith.constant 1.000000e-01 : f32
    %3 = vector.broadcast %cst : f32 to vector<1x1024xf32>
    %4 = arith.addf %2, %3 : vector<1x1024xf32>
    %5 = arith.divf %1, %4 : vector<1x1024xf32>
    %cst_1 = arith.constant 1.000000e-01 : f32
    %6 = vector.broadcast %cst_1 : f32 to vector<1x1024xf32>
    %7 = arith.addf %1, %6 : vector<1x1024xf32>
    %8 = arith.divf %2, %7 : vector<1x1024xf32>
    %cst_2 = arith.constant 0.000000e+00 : f32
    %9 = vector.broadcast %cst_2 : f32 to vector<4x1024xf32>
    %10 = tpu.concatenate %0, %5, %8, %9 in 0 : vector<2x1024xf32>, vector<1x1024xf32>, vector<1x1024xf32>, vector<4x1024xf32> -> vector<8x1024xf32>
    %c0_3 = arith.constant 0 : index
    %c0_4 = arith.constant 0 : index
    %11 = vector.load %arg2[%c0_3, %c0_4] : memref<32x8xf32, #tpu.memory_space<vmem>>, vector<32x8xf32>
    %cst_5 = arith.constant dense<0.000000e+00> : vector<32x1024xf32>
    %12 = tpu.matmul %11, %10, %cst_5 {dimension_numbers = #tpu.dot_dimension_numbers<[1], [0], [0], [1], [0, 0, 1, 1], [], []>, precision = #tpu.contract_precision<fp32>} : vector<32x8xf32>, vector<8x1024xf32>, vector<32x1024xf32> -> vector<32x1024xf32>
    %c0_6 = arith.constant 0 : index
    %c0_7 = arith.constant 0 : index
    %13 = vector.load %arg3[%c0_6, %c0_7] : memref<32x1xf32, #tpu.memory_space<vmem>>, vector<32x1xf32>
    %14 = vector.broadcast %13 : vector<32x1xf32> to vector<32x1024xf32>
    %15 = arith.addf %12, %14 : vector<32x1024xf32>
    %cst_8 = arith.constant 0.000000e+00 : f32
    %16 = vector.broadcast %cst_8 : f32 to vector<32x1024xf32>
    %17 = arith.cmpf ogt, %15, %16 : vector<32x1024xf32>
    %cst_9 = arith.constant 2.000000e-01 : f32
    %18 = vector.broadcast %cst_9 : f32 to vector<32x1024xf32>
    %19 = arith.mulf %18, %15 : vector<32x1024xf32>
    %20 = arith.select %17, %15, %19 : vector<32x1024xi1>, vector<32x1024xf32>
    %c0_10 = arith.constant 0 : index
    %c0_11 = arith.constant 0 : index
    %21 = vector.load %arg4[%c0_10, %c0_11] : memref<32x32xf32, #tpu.memory_space<vmem>>, vector<32x32xf32>
    %cst_12 = arith.constant dense<0.000000e+00> : vector<32x1024xf32>
    %22 = tpu.matmul %21, %20, %cst_12 {dimension_numbers = #tpu.dot_dimension_numbers<[1], [0], [0], [1], [0, 0, 1, 1], [], []>, precision = #tpu.contract_precision<fp32>} : vector<32x32xf32>, vector<32x1024xf32>, vector<32x1024xf32> -> vector<32x1024xf32>
    %c0_13 = arith.constant 0 : index
    %c0_14 = arith.constant 0 : index
    %23 = vector.load %arg5[%c0_13, %c0_14] : memref<32x1xf32, #tpu.memory_space<vmem>>, vector<32x1xf32>
    %24 = vector.broadcast %23 : vector<32x1xf32> to vector<32x1024xf32>
    %25 = arith.addf %22, %24 : vector<32x1024xf32>
    %cst_15 = arith.constant 0.000000e+00 : f32
    %26 = vector.broadcast %cst_15 : f32 to vector<32x1024xf32>
    %27 = arith.cmpf ogt, %25, %26 : vector<32x1024xf32>
    %cst_16 = arith.constant 2.000000e-01 : f32
    %28 = vector.broadcast %cst_16 : f32 to vector<32x1024xf32>
    %29 = arith.mulf %28, %25 : vector<32x1024xf32>
    %30 = arith.select %27, %25, %29 : vector<32x1024xi1>, vector<32x1024xf32>
    %c0_17 = arith.constant 0 : index
    %c0_18 = arith.constant 0 : index
    %31 = vector.load %arg6[%c0_17, %c0_18] : memref<32x1xf32, #tpu.memory_space<vmem>>, vector<32x1xf32>
    %32 = vector.broadcast %31 : vector<32x1xf32> to vector<32x1024xf32>
    %33 = arith.mulf %30, %32 : vector<32x1024xf32>
    %cst_19 = arith.constant dense<0.000000e+00> : vector<1024xf32>
    %34 = vector.multi_reduction <add>, %33, %cst_19 [0] : vector<32x1024xf32> to vector<1024xf32>
    %35 = vector.shape_cast %34 : vector<1024xf32> to vector<1x1024xf32>
    %c0_20 = arith.constant 0 : index
    %c0_21 = arith.constant 0 : index
    %36 = vector.load %arg7[%c0_20, %c0_21] : memref<1x1xf32, #tpu.memory_space<vmem>>, vector<1x1xf32>
    %37 = vector.broadcast %36 : vector<1x1xf32> to vector<1x1024xf32>
    %38 = arith.addf %35, %37 : vector<1x1024xf32>
    %39 = arith.negf %38 : vector<1x1024xf32>
    %40 = math.exp %39 : vector<1x1024xf32>
    %cst_22 = arith.constant 1.000000e+00 : f32
    %41 = vector.broadcast %cst_22 : f32 to vector<1x1024xf32>
    %42 = arith.addf %41, %40 : vector<1x1024xf32>
    %43 = arith.divf %41, %42 : vector<1x1024xf32>
    %c0_23 = arith.constant 0 : index
    %c0_24 = arith.constant 0 : index
    %44 = vector.load %arg8[%c0_23, %c0_24] : memref<1x1024xf32, #tpu.memory_space<vmem>>, vector<1x1024xf32>
    tpu.vector_store %arg8[%c0_23, %c0_24], %43 {strides = array<i32>} : memref<1x1024xf32, #tpu.memory_space<vmem>>, vector<1x1024xf32>,
    return
  }
  func.func @transform_0(%arg0: i32) -> (i32, i32) {
    %c0_i32 = arith.constant 0 : i32
    %c0_i32_0 = arith.constant 0 : i32
    return %c0_i32, %arg0 : i32, i32
  }
  func.func @transform_1(%arg0: i32) -> (i32, i32) {
    %c0_i32 = arith.constant 0 : i32
    %c0_i32_0 = arith.constant 0 : i32
    %c0_i32_1 = arith.constant 0 : i32
    return %c0_i32, %c0_i32_0 : i32, i32
  }
  func.func @transform_2(%arg0: i32) -> (i32, i32) {
    %c0_i32 = arith.constant 0 : i32
    %c0_i32_0 = arith.constant 0 : i32
    %c0_i32_1 = arith.constant 0 : i32
    return %c0_i32, %c0_i32_0 : i32, i32
  }
  func.func @transform_3(%arg0: i32) -> (i32, i32) {
    %c0_i32 = arith.constant 0 : i32
    %c0_i32_0 = arith.constant 0 : i32
    %c0_i32_1 = arith.constant 0 : i32
    return %c0_i32, %c0_i32_0 : i32, i32
  }
  func.func @transform_4(%arg0: i32) -> (i32, i32) {
    %c0_i32 = arith.constant 0 : i32
    %c0_i32_0 = arith.constant 0 : i32
    %c0_i32_1 = arith.constant 0 : i32
    return %c0_i32, %c0_i32_0 : i32, i32
  }
  func.func @transform_5(%arg0: i32) -> (i32, i32) {
    %c0_i32 = arith.constant 0 : i32
    %c0_i32_0 = arith.constant 0 : i32
    %c0_i32_1 = arith.constant 0 : i32
    return %c0_i32, %c0_i32_0 : i32, i32
  }
  func.func @transform_6(%arg0: i32) -> (i32, i32) {
    %c0_i32 = arith.constant 0 : i32
    %c0_i32_0 = arith.constant 0 : i32
    %c0_i32_1 = arith.constant 0 : i32
    return %c0_i32, %c0_i32_0 : i32, i32
  }
  func.func @transform_7(%arg0: i32) -> (i32, i32) {
    %c0_i32 = arith.constant 0 : i32
    %c0_i32_0 = arith.constant 0 : i32
    return %c0_i32, %arg0 : i32, i32
  }
}

</mosaic_0001>

<bundles_post_ra>
// kernel: tpu_custom_call.1
= control target key start
LH: loop header
LB: loop body
LE: loop exit
PB: predicated region body
PF: predicated region fallthrough
CT: control target
= control target key end

     0   :  { %s8094_s0 = inlined_call_operand.vmem [shape: f32[2,1024], index: 0, kind: input, shape index: {}]   ;;  %s8095_s1 = inlined_call_operand.vmem [shape: f32[32,8], index: 1, kind: input, shape index: {}]   ;;  %s8096_s2 = inlined_call_operand.vmem [shape: f32[32,1], index: 2, kind: input, shape index: {}]   ;;  %s8097_s3 = inlined_call_operand.vmem [shape: f32[32,32], index: 3, kind: input, shape index: {}]   ;;  %s8098_s4 = inlined_call_operand.vmem [shape: f32[32,1], index: 4, kind: input, shape index: {}]   ;;  %s8099_s5 = inlined_call_operand.vmem [shape: f32[32,1], index: 5, kind: input, shape index: {}]   ;;  %s8100_s6 = inlined_call_operand.<no memory space> [shape: f32[1,1], index: 6, kind: input, shape index: {}]   ;;  %s8101_s7 = inlined_call_operand.hbm [shape: f32[1,1024], index: 7, kind: output, shape index: {}]  }
   0x1   :  { %v12_v0 = vstv %s8100_s6 }
   0x2   :  { %13 = vst [vmem:[#allocation2] sm:$0x1] %v12_v0 }
   0x3   :  { %v6663_v1 = vld [vmem:[%s8094_s0] sm:$0xff]  ;;  %v57_v2 = vlaneseq  ;;  %v6612_v5 = vmov 1983009808   ;;  %v207_v7 = vld [vmem:[%s8095_s1 + $0x8] sm:$0xff]  ;;  %vm234_vm0 = vcmask 64512  }
   0x4   :  { %v206_v3 = vld [vmem:[%s8095_s1] sm:$0xff]  ;;  %v31_v4 = vadd.f32 0.1, %v6663_v1  ;;  %v55_v6 = vunpack.c.l.s4 %v6612_v5 }
   0x5   :  { %14 = vsyncpa [#allocation4], 0  ;;  %v8102_v9 = vmov 0.0   ;;  %v236_v10 = vsel %vm234_vm0, %v206_v3, 0  ;;  %v6675_v12 = vshrl.u32 %v57_v2, 7  ;;  %v239_v13 = vsel %vm234_vm0, %v207_v7, 0 }
   0x6   :  { %v35_v8 = vrot.slane %v31_v4, 7  ;;  %313 = vmatprep.mubr.f32.mxu0 %v8102_v9  ;;  %925 = vmatprep.mubr.f32.mxu1 %v8102_v9  ;;  %v56_v11 = vunpack.c.0.s8 %v55_v6  ;;  %v208_v15 = vld [vmem:[%s8095_s1 + $0x10] sm:$0xff]  ;;  %v6684_v16 = vld [vmem:[%s8094_s0 + $0x8] sm:$0xff]  ;;  %v6686_v17 = vand.u32 4294901760, %v236_v10  ;;  %v6688_v18 = vand.u32 4294901760, %v239_v13  ;;  %v209_v19 = vld [vmem:[%s8095_s1 + $0x18] sm:$0xff] }
   0x7   :  { %8124 = vst [vmem:[#allocation6_spill] sm:$0xff] %v6675_v12  ;;  %v242_v21 = vsel %vm234_vm0, %v208_v15, 0  ;;  %v32_v22 = vadd.f32 0.1, %v6684_v16  ;;  %v53_v25 = vcombine.high %v6663_v1, %v6663_v1  ;;  %v245_v27 = vsel %vm234_vm0, %v209_v19, 0 }
   0x8   :  { %v36_v14 = vrot.slane %v35_v8, 2  ;;  %6548 = vrcp.f32 %v35_v8  ;;  %v59_v20 = vsub.s32 %v56_v11, %v6675_v12  ;;  %v6697_v23 = vsub.f32 %v236_v10, %v6686_v17 }
   0x9   :  { %v6699_v24 = vand.u32 4294901760, %v242_v21  ;;  %v6704_v26 = vsub.f32 %v239_v13, %v6688_v18  ;;  %v37_v28 = vrot.slane %v32_v22, 7  ;;  %vm179_vm1 = vcmask 1041408  }
   0xa   :  { %6550 = vrcp.f32 %v36_v14  ;;  %v60_v29 = vrot.slane %v6663_v1, %v59_v20  ;;  %v103_v30 = vsub.s32 2, %v6675_v12  ;;  %v145_v31 = vsub.s32 3, %v6675_v12 }
   0xb   :  { %vm188_vm2 = vcmask 1042432   ;;  %v38_v32 = vrot.slane %v37_v28, 2  ;;  %vm197_vm3 = vcmask 1043456   ;;  %v6711_v33 = vand.u32 4294901760, %v6697_v23 }
   0xc   :  { %v6714_v34 = vsub.f32 %v242_v21, %v6699_v24  ;;  %v6716_v35 = vand.u32 4294901760, %v245_v27  ;;  %6552 = vrcp.f32 %v37_v28  ;;  %v67_v36 = vrot.slane %v53_v25, %v59_v20 }
   0xd   :  { %v6719_v37 = vand.u32 4294901760, %v6704_v26  ;;  %6554 = vrcp.f32 %v38_v32  ;;  %v6722_v38 = vrot.slane %v6684_v16, %v59_v20  ;;  %v111_v40 = vsub.s32 6, %v6675_v12 }
   0xe   :  { %v153_v41 = vsub.s32 7, %v6675_v12  ;;  %v141_v42 = vsub.s32 1, %v6675_v12  ;;  %v149_v43 = vsub.s32 5, %v6675_v12  ;;  %v68_v45 = vcombine.high %v60_v29, %v60_v29 }
   0xf   :  { %v6730_v46 = vsub.s32 0, %v6675_v12  ;;  %v107_v47 = vsub.s32 4, %v6675_v12  ;;  %v317_v49 = vsub.f32 %v6697_v23, %v6711_v33  ;;  %v6736_v50 = vand.u32 4294901760, %v6714_v34 }
  0x10   :  { %v6739_v51 = vsub.f32 %v245_v27, %v6716_v35  ;;  %v70_v52 = vcombine.high %v6684_v16, %v6684_v16  ;;  %v69_v54 = vcombine.high %v67_v36, %v67_v36  ;;  %v328_v55 = vsub.f32 %v6704_v26, %v6719_v37 }
  0x11   :  { %8125 = vst [vmem:[#allocation7_spill] sm:$0xff] %v6730_v46  ;;  %v85_v56 = vcombine.high %v6722_v38, %v6722_v38  ;;  %v339_v2 = vsub.f32 %v6714_v34, %v6736_v50  ;;  %vm2819_vm4 = vcmask 261120  }
  0x12   :  { %v6549_v39 = vpop.eup %6548  ;;  %v6768_v3 = vand.u32 4294901760, %v6739_v51  ;;  %v6770_v4 = vrot.slane %v70_v52, %v59_v20 }
  0x13   :  { %v48_v44 = vmul.f32 %v6549_v39, %v6663_v1 }
  0x14   :  { %v6551_v48 = vpop.eup %6550 }
  0x15   :  { %v42_v53 = vmul.f32 %v6551_v48, %v6663_v1  ;;  %v146_v57 = vrot.slane %v48_v44, %v145_v31  ;;  %v154_v58 = vrot.slane %v48_v44, %v153_v41  ;;  %v142_v59 = vrot.slane %v48_v44, %v141_v42 }
  0x16   :  { %v150_v60 = vrot.slane %v48_v44, %v149_v43  ;;  %v6763_v1 = vand.u32 4294901760, %v317_v49  ;;  %v6553_v10 = vpop.eup %6552 }
  0x17   :  { %v104_v61 = vrot.slane %v42_v53, %v103_v30  ;;  %v112_v62 = vrot.slane %v42_v53, %v111_v40  ;;  %v100_v63 = vrot.slane %v42_v53, %v6730_v46  ;;  %v108_v0 = vrot.slane %v42_v53, %v107_v47  ;;  %v6555_v19 = vpop.eup %6554 }
  0x18   :  { %v44_v39 = vmul.f32 %v6555_v19, %v6684_v16  ;;  %v50_v44 = vmul.f32 %v6553_v10, %v6684_v16  ;;  %v6811_v16 = vand.u32 4294901760, %v328_v55 }
  0x19   :  { %v181_v5 = vsel %vm179_vm1, %v68_v45, %v104_v61  ;;  %v183_v6 = vsel %vm179_vm1, %v69_v54, %v112_v62  ;;  %v180_v7 = vsel %vm179_vm1, %v60_v29, %v100_v63  ;;  %v182_v8 = vsel %vm179_vm1, %v67_v36, %v108_v0 }
  0x1a   :  { %v190_v11 = vsel %vm188_vm2, %v181_v5, %v146_v57  ;;  %v192_v13 = vsel %vm188_vm2, %v183_v6, %v154_v58  ;;  %v189_v14 = vsel %vm188_vm2, %v180_v7, %v142_v59  ;;  %v191_v15 = vsel %vm188_vm2, %v182_v8, %v150_v60 }
  0x1b   :  { %v199_v20 = vsel %vm197_vm3, %v190_v11, 0.0  ;;  %v201_v21 = vsel %vm197_vm3, %v192_v13, 0.0  ;;  %v198_v22 = vsel %vm197_vm3, %v189_v14, 0.0  ;;  %v200_v25 = vsel %vm197_vm3, %v191_v15, 0.0 }
  0x1c   :  { %v6784_v27 = vand.u32 4294901760, %v199_v20  ;;  %v6786_v28 = vand.u32 4294901760, %v201_v21  ;;  %v6788_v29 = vand.u32 4294901760, %v198_v22  ;;  %v6790_v32 = vand.u32 4294901760, %v200_v25 }
  0x1d   :  { %v350_v36 = vsub.f32 %v6739_v51, %v6768_v3  ;;  %v86_v45 = vcombine.high %v6770_v4, %v6770_v4  ;;  %v120_v54 = vrot.slane %v44_v39, %v103_v30  ;;  %v162_v57 = vrot.slane %v50_v44, %v145_v31 }
  0x1e   :  { %248 = vmatprep.subr.mxu0 %v6784_v27  ;;  %860 = vmatprep.subr.mxu1 %v6786_v28  ;;  %v6801_v48 = vsub.f32 %v198_v22, %v6788_v29  ;;  %v6804_v49 = vsub.f32 %v200_v25, %v6790_v32  ;;  %v6807_v52 = vsub.f32 %v199_v20, %v6784_v27  ;;  %v6855_v13 = vand.u32 4294901760, %v339_v2 }
  0x1f   :  { %250 = vmatpush1.msra.mxu0 %v6788_v29  ;;  %862 = vmatpush1.msra.mxu1 %v6790_v32  ;;  %v6814_v53 = vsub.f32 %v201_v21, %v6786_v28  ;;  %v128_v60 = vrot.slane %v44_v39, %v111_v40  ;;  %v185_v31 = vsel %vm179_vm1, %v85_v56, %v120_v54  ;;  %v2797_v54 = vld [vmem:[%s8098_s4 + $0x10] sm:$0xff] }
  0x20   :  { %319 = vmatmul.mubr.f32.vlgmr.msra.gmra.mrb[0].mxu0 %v6763_v1  ;;  %931 = vmatmul.mubr.f32.vlgmr.msra.gmra.mrb[0].mxu1 %v6763_v1  ;;  %v360_v58 = vand.u32 4294901760, %v6807_v52  ;;  %v366_v59 = vand.u32 4294901760, %v6801_v48  ;;  %v978_v55 = vand.u32 4294901760, %v6804_v49  ;;  %v170_v61 = vrot.slane %v50_v44, %v153_v41 }
  0x21   :  { %324 = vmatprep.mubr.f32.mxu0 %v8102_v9  ;;  %936 = vmatprep.mubr.f32.mxu1 %v8102_v9  ;;  %v972_v30 = vand.u32 4294901760, %v6814_v53  ;;  %v116_v62 = vrot.slane %v44_v39, %v6730_v46  ;;  %v194_v5 = vsel %vm188_vm2, %v185_v31, %v162_v57  ;;  %v187_v6 = vsel %vm179_vm1, %v86_v45, %v128_v60  ;;  %v212_v45 = vld [vmem:[%s8096_s2 + $0x10] sm:$0xff]  ;;  %v213_v57 = vld [vmem:[%s8096_s2 + $0x18] sm:$0xff]  ;;  %v5688_v60 = vld [vmem:[%s8099_s5] sm:$0xff] }
  0x22   :  { %v361_v63 = vsub.f32 %v6807_v52, %v360_v58  ;;  %v367_v40 = vsub.f32 %v6801_v48, %v366_v59  ;;  %v979_v0 = vsub.f32 %v6804_v49, %v978_v55  ;;  %v6848_v56 = vsel %vm197_vm3, %v194_v5, 0.0  ;;  %v2796_v31 = vld [vmem:[%s8098_s4 + $0x8] sm:$0xff] }
  0x23   :  { %v973_v41 = vsub.f32 %v6814_v53, %v972_v30  ;;  %v158_v7 = vrot.slane %v50_v44, %v141_v42  ;;  %v196_v15 = vsel %vm188_vm2, %v187_v6, %v170_v61  ;;  %v184_v19 = vsel %vm179_vm1, %v6722_v38, %v116_v62  ;;  %v5691_v61 = vld [vmem:[%s8099_s5 + $0x18] sm:$0xff] }
  0x24   :  { %330 = vmatmul.mubr.f32.gmra.mrb[2].mxu0 %v6811_v16  ;;  %942 = vmatmul.mubr.f32.gmra.mrb[2].mxu1 %v6811_v16  ;;  %v362_v8 = vand.u32 4294901760, %v361_v63  ;;  %v368_v10 = vand.u32 4294901760, %v367_v40  ;;  %v980_v11 = vand.u32 4294901760, %v979_v0  ;;  %v124_v42 = vrot.slane %v44_v39, %v107_v47  ;;  %v211_v39 = vld [vmem:[%s8096_s2 + $0x8] sm:$0xff] }
  0x25   :  { %v974_v14 = vand.u32 4294901760, %v973_v41  ;;  %335 = vmatprep.mubr.f32.mxu0 %v8102_v9  ;;  %947 = vmatprep.mubr.f32.mxu1 %v8102_v9  ;;  %v6865_v20 = vsel %vm197_vm3, %v196_v15, 0.0  ;;  %v193_v2 = vsel %vm188_vm2, %v184_v19, %v158_v7  ;;  %v166_v21 = vrot.slane %v50_v44, %v149_v43  ;;  %v2795_v44 = vld [vmem:[%s8098_s4] sm:$0xff] }
  0x26   :  { %363 = vmatprep.subr.mxu0 %v362_v8  ;;  %v6871_v22 = vsel %vm197_vm3, %v193_v2, 0.0  ;;  %v186_v38 = vsel %vm179_vm1, %v6770_v4, %v124_v42  ;;  %v6876_v47 = vand.u32 4294901760, %v350_v36  ;;  %v210_v4 = vld [vmem:[%s8096_s2] sm:$0xff]  ;;  %v6614_v36 = vmov 0  }
  0x27   :  { %975 = vmatprep.subr.mxu1 %v974_v14  ;;  %369 = vmatpush1.msra.mxu0 %v368_v10  ;;  %v195_v25 = vsel %vm188_vm2, %v186_v38, %v166_v21  ;;  %v7034_v62 = vand.u32 4294901760, %v6871_v22 }
  0x28   :  { %981 = vmatpush1.msra.mxu1 %v980_v11  ;;  %341 = vmatmul.mubr.f32.gmra.mrb[4].mxu0 %v6855_v13  ;;  %v6882_v43 = vsel %vm197_vm3, %v195_v25, 0.0 }
  0x29   :  { %953 = vmatmul.mubr.f32.gmra.mrb[4].mxu1 %v6855_v13  ;;  %346 = vmatprep.mubr.f32.mxu0 %v8102_v9  ;;  %v7037_v63 = vand.u32 4294901760, %v6882_v43  ;;  %v7046_v5 = vsub.f32 %v6871_v22, %v7034_v62 }
  0x2a   :  { %958 = vmatprep.mubr.f32.mxu1 %v8102_v9  ;;  %463 = vmatprep.subr.mxu0 %v6807_v52  ;;  %v5690_v52 = vld [vmem:[%s8099_s5 + $0x10] sm:$0xff] }
  0x2b   :  { %1075 = vmatprep.subr.mxu1 %v6814_v53  ;;  %6544 = vset.pattern.permute.xlu0 %v6614_v36  ;;  %v2798_v53 = vld [vmem:[%s8098_s4 + $0x18] sm:$0xff]  ;;  %v7051_v41 = vsub.f32 %v6882_v43, %v7037_v63 }
  0x2c   :  { %352 = vmatmul.mubr.f32.gmra.mrb[6].mxu0 %v6876_v47  ;;  %216 = vperm.xlu0 %6544, %v210_v4  }
  0x2d   :  { %964 = vmatmul.mubr.f32.gmra.mrb[6].mxu1 %v6876_v47  ;;  %432 = vmatprep.mubr.f32.mxu0 %v8102_v9  ;;  %v2202_v6 = vand.u32 4294901760, %v7051_v41 }
  0x2e   :  { %1044 = vmatprep.mubr.f32.mxu1 %v8102_v9  ;;  %6545 = vset.pattern.permute.xlu1 %v6614_v36 }
  0x2f   :  { %226 = vperm.xlu1 %6545, %v212_v45   ;;  %v2203_v8 = vsub.f32 %v7051_v41, %v2202_v6 }
  0x30   :  { %434 = vmatmul.mubr.f32.vlgmr.msra.gmra.mrb[0].mxu0 %v6686_v17  ;;  %221 = vperm.xlu0 %6544, %v211_v39  }
  0x31   :  { %1046 = vmatmul.mubr.f32.vlgmr.msra.gmra.mrb[0].mxu1 %v6686_v17  ;;  %439 = vmatprep.mubr.f32.mxu0 %v8102_v9  ;;  %v2204_v11 = vand.u32 4294901760, %v2203_v8 }
  0x32   :  { %1051 = vmatprep.mubr.f32.mxu1 %v8102_v9  ;;  %466 = vmatpush1.msra.mxu0 %v6801_v48 }
  0x33   :  { %1078 = vmatpush1.msra.mxu1 %v6804_v49  ;;  %563 = vmatprep.subr.mxu0 %v6784_v27 }
  0x34   :  { %441 = vmatmul.mubr.f32.gmra.mrb[2].mxu0 %v6688_v18  ;;  %1175 = vmatprep.subr.mxu1 %v6786_v28 }
  0x35   :  { %1053 = vmatmul.mubr.f32.gmra.mrb[2].mxu1 %v6688_v18  ;;  %446 = vmatprep.mubr.f32.mxu0 %v8102_v9 }
  0x36   :  { %1058 = vmatprep.mubr.f32.mxu1 %v8102_v9  ;;  %2801 = vperm.xlu0 %6544, %v2795_v44  }
  0x37   :  { %231 = vperm.xlu1 %6545, %v213_v57  }
  0x38   :  { %448 = vmatmul.mubr.f32.gmra.mrb[4].mxu0 %v6699_v24 }
  0x39   :  { %1060 = vmatmul.mubr.f32.gmra.mrb[4].mxu1 %v6699_v24  ;;  %453 = vmatprep.mubr.f32.mxu0 %v8102_v9 }
  0x3a   :  { %1065 = vmatprep.mubr.f32.mxu1 %v8102_v9  ;;  %2811 = vperm.xlu0 %6544, %v2797_v54  }
  0x3b   :  { %2806 = vperm.xlu1 %6545, %v2796_v31  }
  0x3c   :  { %455 = vmatmul.mubr.f32.gmra.mrb[6].mxu0 %v6716_v35 }
  0x3d   :  { %1067 = vmatmul.mubr.f32.gmra.mrb[6].mxu1 %v6716_v35  ;;  %529 = vmatprep.mubr.f32.mxu0 %v8102_v9 }
  0x3e   :  { %1141 = vmatprep.mubr.f32.mxu1 %v8102_v9  ;;  %5694 = vperm.xlu0 %6544, %v5688_v60  }
  0x3f   :  { %2816 = vperm.xlu1 %6545, %v2798_v53  }
  0x40   :  { %532 = vmatmul.mubr.f32.vlgmr.msra.gmra.mrb[0].mxu0 %v6697_v23 }
  0x41   :  { %1144 = vmatmul.mubr.f32.vlgmr.msra.gmra.mrb[0].mxu1 %v6697_v23  ;;  %537 = vmatprep.mubr.f32.mxu0 %v8102_v9 }
  0x42   :  { %1149 = vmatprep.mubr.f32.mxu1 %v8102_v9  ;;  %565 = vmatpush1.msra.mxu0 %v6788_v29 }
  0x43   :  { %1177 = vmatpush1.msra.mxu1 %v6790_v32  ;;  %668 = vmatprep.subr.mxu0 %v360_v58  ;;  %v5816_v58 = vld [vmem:[#allocation2] sm:$0x1] }
  0x44   :  { %540 = vmatmul.mubr.f32.gmra.mrb[2].mxu0 %v6704_v26  ;;  %1280 = vmatprep.subr.mxu1 %v972_v30  ;;  %v5689_v30 = vld [vmem:[%s8099_s5 + $0x8] sm:$0xff] }
  0x45   :  { %1152 = vmatmul.mubr.f32.gmra.mrb[2].mxu1 %v6704_v26  ;;  %545 = vmatprep.mubr.f32.mxu0 %v8102_v9 }
  0x46   :  { %1157 = vmatprep.mubr.f32.mxu1 %v8102_v9  ;;  %5704 = vperm.xlu0 %6544, %v5690_v52  }
  0x47   :  { %5699 = vperm.xlu1 %6545, %v5689_v30  }
  0x48   :  { %548 = vmatmul.mubr.f32.gmra.mrb[4].mxu0 %v6714_v34 }
  0x49   :  { %1160 = vmatmul.mubr.f32.gmra.mrb[4].mxu1 %v6714_v34  ;;  %553 = vmatprep.mubr.f32.mxu0 %v8102_v9 }
  0x4a   :  { %1165 = vmatprep.mubr.f32.mxu1 %v8102_v9  ;;  %5819 = vperm.xlu0 %6544, %v5816_v58  }
  0x4b   :  { %5709 = vperm.xlu1 %6545, %v5691_v61  }
  0x4c   :  { %556 = vmatmul.mubr.f32.gmra.mrb[6].mxu0 %v6739_v51 }
  0x4d   :  { %1168 = vmatmul.mubr.f32.gmra.mrb[6].mxu1 %v6739_v51  ;;  %628 = vmatprep.mubr.f32.mxu0 %v8102_v9 }
  0x4e   :  { %1240 = vmatprep.mubr.f32.mxu1 %v8102_v9 }
  0x50   :  { %632 = vmatmul.mubr.f32.vlgmr.msra.gmra.mrb[0].mxu0 %v6711_v33 }
  0x51   :  { %1244 = vmatmul.mubr.f32.vlgmr.msra.gmra.mrb[0].mxu1 %v6711_v33  ;;  %637 = vmatprep.mubr.f32.mxu0 %v8102_v9 }
  0x52   :  { %1249 = vmatprep.mubr.f32.mxu1 %v8102_v9  ;;  %672 = vmatpush1.msra.mxu0 %v366_v59 }
  0x53   :  { %1284 = vmatpush1.msra.mxu1 %v978_v55  ;;  %765 = vmatprep.subr.mxu0 %v6784_v27  ;;  %v6992_v27 = vand.u32 4294901760, %v6848_v56 }
  0x54   :  { %641 = vmatmul.mubr.f32.gmra.mrb[2].mxu0 %v6719_v37  ;;  %1377 = vmatprep.subr.mxu1 %v6786_v28  ;;  %v6996_v28 = vand.u32 4294901760, %v6865_v20 }
  0x55   :  { %1253 = vmatmul.mubr.f32.gmra.mrb[2].mxu1 %v6719_v37  ;;  %646 = vmatprep.mubr.f32.mxu0 %v8102_v9  ;;  %v7006_v48 = vsub.f32 %v6848_v56, %v6992_v27  ;;  %v1590_v56 = vand.u32 4294901760, %v7046_v5 }
  0x56   :  { %1258 = vmatprep.mubr.f32.mxu1 %v8102_v9  ;;  %v7012_v49 = vsub.f32 %v6865_v20, %v6996_v28 }
  0x57   :  { %v1591_v7 = vsub.f32 %v7046_v5, %v1590_v56 }
  0x58   :  { %650 = vmatmul.mubr.f32.gmra.mrb[4].mxu0 %v6736_v50 }
  0x59   :  { %1262 = vmatmul.mubr.f32.gmra.mrb[4].mxu1 %v6736_v50  ;;  %655 = vmatprep.mubr.f32.mxu0 %v8102_v9  ;;  %v1592_v10 = vand.u32 4294901760, %v1591_v7 }
  0x5a   :  { %1267 = vmatprep.mubr.f32.mxu1 %v8102_v9 }
  0x5c   :  { %659 = vmatmul.mubr.f32.gmra.mrb[6].mxu0 %v6768_v3 }
  0x5d   :  { %1271 = vmatmul.mubr.f32.gmra.mrb[6].mxu1 %v6768_v3  ;;  %735 = vmatprep.mubr.f32.mxu0 %v8102_v9 }
  0x5e   :  { %1347 = vmatprep.mubr.f32.mxu1 %v8102_v9 }
  0x60   :  { %737 = vmatmul.mubr.f32.vlgmr.msra.gmra.mrb[0].mxu0 %v6686_v17 }
  0x61   :  { %1349 = vmatmul.mubr.f32.vlgmr.msra.gmra.mrb[0].mxu1 %v6686_v17  ;;  %742 = vmatprep.mubr.f32.mxu0 %v8102_v9 }
  0x62   :  { %1354 = vmatprep.mubr.f32.mxu1 %v8102_v9  ;;  %767 = vmatpush1.msra.mxu0 %v6788_v29  ;;  %v1584_v29 = vand.u32 4294901760, %v7006_v48 }
  0x63   :  { %1379 = vmatpush1.msra.mxu1 %v6790_v32  ;;  %1472 = vmatprep.subr.mxu0 %v6992_v27  ;;  %v2196_v32 = vand.u32 4294901760, %v7012_v49 }
  0x64   :  { %744 = vmatmul.mubr.f32.gmra.mrb[2].mxu0 %v6688_v18  ;;  %2084 = vmatprep.subr.mxu1 %v6996_v28  ;;  %v1585_v59 = vsub.f32 %v7006_v48, %v1584_v29 }
  0x65   :  { %1356 = vmatmul.mubr.f32.gmra.mrb[2].mxu1 %v6688_v18  ;;  %749 = vmatprep.mubr.f32.mxu0 %v8102_v9  ;;  %v2197_v55 = vsub.f32 %v7012_v49, %v2196_v32 }
  0x66   :  { %1361 = vmatprep.mubr.f32.mxu1 %v8102_v9  ;;  %v1586_v40 = vand.u32 4294901760, %v1585_v59 }
  0x67   :  { %v2198_v0 = vand.u32 4294901760, %v2197_v55 }
  0x68   :  { %751 = vmatmul.mubr.f32.gmra.mrb[4].mxu0 %v6699_v24 }
  0x69   :  { %1363 = vmatmul.mubr.f32.gmra.mrb[4].mxu1 %v6699_v24  ;;  %756 = vmatprep.mubr.f32.mxu0 %v8102_v9 }
  0x6a   :  { %1368 = vmatprep.mubr.f32.mxu1 %v8102_v9 }
  0x6c   :  { %758 = vmatmul.mubr.f32.gmra.mrb[6].mxu0 %v6716_v35 }
  0x6d   :  { %1370 = vmatmul.mubr.f32.gmra.mrb[6].mxu1 %v6716_v35  ;;  %830 = vmatprep.mubr.f32.mxu0 %v8102_v9 }
  0x6e   :  { %1442 = vmatprep.mubr.f32.mxu1 %v8102_v9 }
  0x70   :  { %832 = vmatmul.mubr.f32.vlgmr.msra.gmra.mrb[0].mxu0 %v6686_v17 }
  0x71   :  { %1444 = vmatmul.mubr.f32.vlgmr.msra.gmra.mrb[0].mxu1 %v6686_v17  ;;  %837 = vmatprep.mubr.f32.mxu0 %v8102_v9 }
  0x72   :  { %1449 = vmatprep.mubr.f32.mxu1 %v8102_v9  ;;  %1474 = vmatpush1.msra.mxu0 %v7034_v62 }
  0x73   :  { %2086 = vmatpush1.msra.mxu1 %v7037_v63  ;;  %1587 = vmatprep.subr.mxu0 %v1586_v40 }
  0x74   :  { %839 = vmatmul.mubr.f32.gmra.mrb[2].mxu0 %v6688_v18  ;;  %2199 = vmatprep.subr.mxu1 %v2198_v0 }
  0x75   :  { %1451 = vmatmul.mubr.f32.gmra.mrb[2].mxu1 %v6688_v18  ;;  %844 = vmatprep.mubr.f32.mxu0 %v8102_v9 }
  0x76   :  { %1456 = vmatprep.mubr.f32.mxu1 %v8102_v9 }
  0x78   :  { %846 = vmatmul.mubr.f32.gmra.mrb[4].mxu0 %v6699_v24 }
  0x79   :  { %1458 = vmatmul.mubr.f32.gmra.mrb[4].mxu1 %v6699_v24  ;;  %851 = vmatprep.mubr.f32.mxu0 %v8102_v9 }
  0x7a   :  { %1463 = vmatprep.mubr.f32.mxu1 %v8102_v9 }
  0x7c   :  { %853 = vmatmul.mubr.f32.gmra.mrb[6].mxu0 %v6716_v35 }
  0x7d   :  { %1465 = vmatmul.mubr.f32.gmra.mrb[6].mxu1 %v6716_v35  ;;  %1537 = vmatprep.mubr.f32.mxu0 %v8102_v9 }
  0x7e   :  { %2149 = vmatprep.mubr.f32.mxu1 %v8102_v9 }
  0x80   :  { %1543 = vmatmul.mubr.f32.vlgmr.msra.gmra.mrb[8].mxu0 %v6763_v1 }
  0x81   :  { %2155 = vmatmul.mubr.f32.vlgmr.msra.gmra.mrb[8].mxu1 %v6763_v1  ;;  %1548 = vmatprep.mubr.f32.mxu0 %v8102_v9 }
  0x82   :  { %2160 = vmatprep.mubr.f32.mxu1 %v8102_v9  ;;  %1593 = vmatpush1.msra.mxu0 %v1592_v10 }
  0x83   :  { %2205 = vmatpush1.msra.mxu1 %v2204_v11  ;;  %1687 = vmatprep.subr.mxu0 %v7006_v48 }
  0x84   :  { %1554 = vmatmul.mubr.f32.gmra.mrb[10].mxu0 %v6811_v16  ;;  %2299 = vmatprep.subr.mxu1 %v7012_v49 }
  0x85   :  { %2166 = vmatmul.mubr.f32.gmra.mrb[10].mxu1 %v6811_v16  ;;  %1559 = vmatprep.mubr.f32.mxu0 %v8102_v9 }
  0x86   :  { %2171 = vmatprep.mubr.f32.mxu1 %v8102_v9 }
  0x88   :  { %1565 = vmatmul.mubr.f32.gmra.mrb[12].mxu0 %v6855_v13 }
  0x89   :  { %2177 = vmatmul.mubr.f32.gmra.mrb[12].mxu1 %v6855_v13  ;;  %1570 = vmatprep.mubr.f32.mxu0 %v8102_v9 }
  0x8a   :  { %2182 = vmatprep.mubr.f32.mxu1 %v8102_v9 }
  0x8c   :  { %1576 = vmatmul.mubr.f32.gmra.mrb[14].mxu0 %v6876_v47 }
  0x8d   :  { %2188 = vmatmul.mubr.f32.gmra.mrb[14].mxu1 %v6876_v47  ;;  %1656 = vmatprep.mubr.f32.mxu0 %v8102_v9 }
  0x8e   :  { %2268 = vmatprep.mubr.f32.mxu1 %v8102_v9 }
  0x90   :  { %1658 = vmatmul.mubr.f32.vlgmr.msra.gmra.mrb[8].mxu0 %v6686_v17 }
  0x91   :  { %2270 = vmatmul.mubr.f32.vlgmr.msra.gmra.mrb[8].mxu1 %v6686_v17  ;;  %1663 = vmatprep.mubr.f32.mxu0 %v8102_v9 }
  0x92   :  { %2275 = vmatprep.mubr.f32.mxu1 %v8102_v9  ;;  %1690 = vmatpush1.msra.mxu0 %v7046_v5 }
  0x93   :  { %2302 = vmatpush1.msra.mxu1 %v7051_v41  ;;  %1787 = vmatprep.subr.mxu0 %v6992_v27 }
  0x94   :  { %1665 = vmatmul.mubr.f32.gmra.mrb[10].mxu0 %v6688_v18  ;;  %2399 = vmatprep.subr.mxu1 %v6996_v28 }
  0x95   :  { %2277 = vmatmul.mubr.f32.gmra.mrb[10].mxu1 %v6688_v18  ;;  %1670 = vmatprep.mubr.f32.mxu0 %v8102_v9 }
  0x96   :  { %2282 = vmatprep.mubr.f32.mxu1 %v8102_v9 }
  0x98   :  { %1672 = vmatmul.mubr.f32.gmra.mrb[12].mxu0 %v6699_v24 }
  0x99   :  { %2284 = vmatmul.mubr.f32.gmra.mrb[12].mxu1 %v6699_v24  ;;  %1677 = vmatprep.mubr.f32.mxu0 %v8102_v9 }
  0x9a   :  { %2289 = vmatprep.mubr.f32.mxu1 %v8102_v9 }
  0x9c   :  { %1679 = vmatmul.mubr.f32.gmra.mrb[14].mxu0 %v6716_v35 }
  0x9d   :  { %2291 = vmatmul.mubr.f32.gmra.mrb[14].mxu1 %v6716_v35  ;;  %1753 = vmatprep.mubr.f32.mxu0 %v8102_v9 }
  0x9e   :  { %2365 = vmatprep.mubr.f32.mxu1 %v8102_v9 }
  0xa0   :  { %1756 = vmatmul.mubr.f32.vlgmr.msra.gmra.mrb[8].mxu0 %v6697_v23 }
  0xa1   :  { %2368 = vmatmul.mubr.f32.vlgmr.msra.gmra.mrb[8].mxu1 %v6697_v23  ;;  %1761 = vmatprep.mubr.f32.mxu0 %v8102_v9 }
  0xa2   :  { %2373 = vmatprep.mubr.f32.mxu1 %v8102_v9  ;;  %1789 = vmatpush1.msra.mxu0 %v7034_v62 }
  0xa3   :  { %2401 = vmatpush1.msra.mxu1 %v7037_v63  ;;  %1892 = vmatprep.subr.mxu0 %v1584_v29 }
  0xa4   :  { %1764 = vmatmul.mubr.f32.gmra.mrb[10].mxu0 %v6704_v26  ;;  %2504 = vmatprep.subr.mxu1 %v2196_v32 }
  0xa5   :  { %2376 = vmatmul.mubr.f32.gmra.mrb[10].mxu1 %v6704_v26  ;;  %1769 = vmatprep.mubr.f32.mxu0 %v8102_v9  ;;  %v2793_v26 = vld [vmem:[%s8097_s3 + $0x10] sm:$0xff] }
  0xa6   :  { %2381 = vmatprep.mubr.f32.mxu1 %v8102_v9 }
  0xa8   :  { %1772 = vmatmul.mubr.f32.gmra.mrb[12].mxu0 %v6714_v34 }
  0xa9   :  { %2384 = vmatmul.mubr.f32.gmra.mrb[12].mxu1 %v6714_v34  ;;  %1777 = vmatprep.mubr.f32.mxu0 %v8102_v9 }
  0xaa   :  { %2389 = vmatprep.mubr.f32.mxu1 %v8102_v9 }
  0xab   :  { %v7227_v42 = vpop.permute.xlu0 %216 }
  0xac   :  { %1780 = vmatmul.mubr.f32.gmra.mrb[14].mxu0 %v6739_v51 }
  0xad   :  { %2392 = vmatmul.mubr.f32.gmra.mrb[14].mxu1 %v6739_v51  ;;  %1852 = vmatprep.mubr.f32.mxu0 %v8102_v9 }
  0xae   :  { %2464 = vmatprep.mubr.f32.mxu1 %v8102_v9 }
  0xaf   :  { %v7249_v31 = vpop.permute.xlu0 %221 }
  0xb0   :  { %1856 = vmatmul.mubr.f32.vlgmr.msra.gmra.mrb[8].mxu0 %v6711_v33 }
  0xb1   :  { %2468 = vmatmul.mubr.f32.vlgmr.msra.gmra.mrb[8].mxu1 %v6711_v33  ;;  %1861 = vmatprep.mubr.f32.mxu0 %v8102_v9 }
  0xb2   :  { %2473 = vmatprep.mubr.f32.mxu1 %v8102_v9  ;;  %1896 = vmatpush1.msra.mxu0 %v1590_v56 }
  0xb3   :  { %2508 = vmatpush1.msra.mxu1 %v2202_v6  ;;  %1989 = vmatprep.subr.mxu0 %v6992_v27 }
  0xb4   :  { %1865 = vmatmul.mubr.f32.gmra.mrb[10].mxu0 %v6719_v37  ;;  %2601 = vmatprep.subr.mxu1 %v6996_v28 }
  0xb5   :  { %2477 = vmatmul.mubr.f32.gmra.mrb[10].mxu1 %v6719_v37  ;;  %1870 = vmatprep.mubr.f32.mxu0 %v8102_v9  ;;  %v2827_v37 = vsel %vm2819_vm4, %v2793_v26, 0 }
  0xb6   :  { %2482 = vmatprep.mubr.f32.mxu1 %v8102_v9 }
  0xb8   :  { %1874 = vmatmul.mubr.f32.gmra.mrb[12].mxu0 %v6736_v50 }
  0xb9   :  { %2486 = vmatmul.mubr.f32.gmra.mrb[12].mxu1 %v6736_v50  ;;  %1879 = vmatprep.mubr.f32.mxu0 %v8102_v9 }
  0xba   :  { %2491 = vmatprep.mubr.f32.mxu1 %v8102_v9 }
  0xbc   :  { %1883 = vmatmul.mubr.f32.gmra.mrb[14].mxu0 %v6768_v3 }
  0xbd   :  { %2495 = vmatmul.mubr.f32.gmra.mrb[14].mxu1 %v6768_v3  ;;  %1959 = vmatprep.mubr.f32.mxu0 %v8102_v9  ;;  %v7211_v3 = vand.u32 4294901760, %v2827_v37 }
  0xbe   :  { %2571 = vmatprep.mubr.f32.mxu1 %v8102_v9 }
  0xbf   :  { %v7222_v15 = vsub.f32 %v2827_v37, %v7211_v3  ;;  %v7291_v37 = vpop.permute.xlu1 %226 }
  0xc0   :  { %1961 = vmatmul.mubr.f32.vlgmr.msra.gmra.mrb[8].mxu0 %v6686_v17 }
  0xc1   :  { %2573 = vmatmul.mubr.f32.vlgmr.msra.gmra.mrb[8].mxu1 %v6686_v17  ;;  %1966 = vmatprep.mubr.f32.mxu0 %v8102_v9  ;;  %v7234_v21 = vand.u32 4294901760, %v7222_v15 }
  0xc2   :  { %2578 = vmatprep.mubr.f32.mxu1 %v8102_v9  ;;  %1991 = vmatpush1.msra.mxu0 %v7034_v62 }
  0xc3   :  { %2603 = vmatpush1.msra.mxu1 %v7037_v63 }
  0xc4   :  { %1968 = vmatmul.mubr.f32.gmra.mrb[10].mxu0 %v6688_v18 }
  0xc5   :  { %2580 = vmatmul.mubr.f32.gmra.mrb[10].mxu1 %v6688_v18  ;;  %1973 = vmatprep.mubr.f32.mxu0 %v8102_v9 }
  0xc6   :  { %2585 = vmatprep.mubr.f32.mxu1 %v8102_v9 }
  0xc8   :  { %1975 = vmatmul.mubr.f32.gmra.mrb[12].mxu0 %v6699_v24 }
  0xc9   :  { %2587 = vmatmul.mubr.f32.gmra.mrb[12].mxu1 %v6699_v24  ;;  %1980 = vmatprep.mubr.f32.mxu0 %v8102_v9 }
  0xca   :  { %2592 = vmatprep.mubr.f32.mxu1 %v8102_v9 }
  0xcc   :  { %1982 = vmatmul.mubr.f32.gmra.mrb[14].mxu0 %v6716_v35 }
  0xcd   :  { %2594 = vmatmul.mubr.f32.gmra.mrb[14].mxu1 %v6716_v35  ;;  %2054 = vmatprep.mubr.f32.mxu0 %v8102_v9 }
  0xce   :  { %2666 = vmatprep.mubr.f32.mxu1 %v8102_v9 }
  0xd0   :  { %2056 = vmatmul.mubr.f32.vlgmr.msra.gmra.mrb[8].mxu0 %v6686_v17 }
  0xd1   :  { %2668 = vmatmul.mubr.f32.vlgmr.msra.gmra.mrb[8].mxu1 %v6686_v17  ;;  %2061 = vmatprep.mubr.f32.mxu0 %v8102_v9  ;;  %v2791_v17 = vld [vmem:[%s8097_s3] sm:$0xff] }
  0xd2   :  { %2673 = vmatprep.mubr.f32.mxu1 %v8102_v9  ;;  %v2821_v23 = vsel %vm2819_vm4, %v2791_v17, 0 }
  0xd3   :  { %v7198_v33 = vand.u32 4294901760, %v2821_v23 }
  0xd4   :  { %2063 = vmatmul.mubr.f32.gmra.mrb[10].mxu0 %v6688_v18 }
  0xd5   :  { %2675 = vmatmul.mubr.f32.gmra.mrb[10].mxu1 %v6688_v18  ;;  %2068 = vmatprep.mubr.f32.mxu0 %v8102_v9  ;;  %v2792_v18 = vld [vmem:[%s8097_s3 + $0x8] sm:$0xff]  ;;  %v7206_v50 = vsub.f32 %v2821_v23, %v7198_v33 }
  0xd6   :  { %2680 = vmatprep.mubr.f32.mxu1 %v8102_v9 }
  0xd7   :  { %v7216_v13 = vand.u32 4294901760, %v7206_v50 }
  0xd8   :  { %2070 = vmatmul.mubr.f32.gmra.mrb[12].mxu0 %v6699_v24 }
  0xd9   :  { %2682 = vmatmul.mubr.f32.gmra.mrb[12].mxu1 %v6699_v24  ;;  %2075 = vmatprep.mubr.f32.mxu0 %v8102_v9  ;;  %v2824_v24 = vsel %vm2819_vm4, %v2792_v18, 0  ;;  %v2908_v20 = vsub.f32 %v7206_v50, %v7216_v13 }
  0xda   :  { %2687 = vmatprep.mubr.f32.mxu1 %v8102_v9  ;;  %v7200_v34 = vand.u32 4294901760, %v2824_v24 }
  0xdb   :  { %v7242_v44 = vand.u32 4294901760, %v2908_v20 }
  0xdc   :  { %2077 = vmatmul.mubr.f32.gmra.mrb[14].mxu0 %v6716_v35  ;;  %v7209_v51 = vsub.f32 %v2824_v24, %v7200_v34 }
  0xdd   :  { %2689 = vmatmul.mubr.f32.gmra.mrb[14].mxu1 %v6716_v35  ;;  %2904 = vmatprep.mubr.f32.mxu0 %v8102_v9  ;;  %v2794_v35 = vld [vmem:[%s8097_s3 + $0x18] sm:$0xff]  ;;  %8126 = vst [vmem:[#allocation8_spill] sm:$0xff] %v7242_v44  ;;  %s6616_s3 = smov [#allocation3]  }
  0xde   :  { %3594 = vmatprep.mubr.f32.mxu1 %v8102_v9  ;;  %v2830_v1 = vsel %vm2819_vm4, %v2794_v35, 0  ;;  %v7219_v14 = vand.u32 4294901760, %v7209_v51  ;;  %s5947_s15 = sshll.u32 %s6616_s3, 4  ;;  %s5948_s15 = int_to_ptr.vmem [resolvable:$true] %s5947_s15 }
  0xdf   :  { %v7213_v16 = vand.u32 4294901760, %v2830_v1  ;;  %s6588_s16 = scalar_lea.vmem %s5948_s15, 128  ;;  %p6593_p1 = scmp.lt.s32.totalorder %s5948_s15, %s5948_s15 }
  0xe0   :  { %v2919_v2 = vsub.f32 %v7209_v51, %v7219_v14  ;;  %p6589_p0 = scmp.ne.s32.totalorder %s5948_s15, %s6588_s16  ;;  %p6594_p2 = scmp.lt.s32.totalorder %s6588_s16, %s6588_s16 }
  0xe1   :  { %v7225_v19 = vsub.f32 %v2830_v1, %v7213_v16 }
  0xe2   :  { %v7244_v45 = vand.u32 4294901760, %v2919_v2  ;;  %p6595_p3 = por %p6594_p2, %p6593_p1 }
  0xe3   :  { %v7238_v43 = vand.u32 4294901760, %v7225_v19 }
  0xe4   :  { %p6596_p4 = pnand %p6595_p3, %p6589_p0 }
 0x143   :  { %v833_v22 = vpop.f32.mrb[0].mxu0 }
 0x144   :  { %v6155_v38 = vadd.f32 %v833_v22, %v7227_v42  ;;  %v1445_v47 = vpop.f32.mrb[0].mxu1  ;;  %v835_v25 = vpop.f32.mrb[1].mxu0 }
 0x145   :  { %v6163_v4 = vadd.f32 %v1445_v47, %v7227_v42  ;;  %v6156_v36 = vadd.f32 %v835_v25, %v7227_v42  ;;  %v1447_v39 = vpop.f32.mrb[1].mxu1 }
 0x146   :  { %vm2695_vm5 = vcmp.gt.f32.partialorder %v6155_v38, 0.0  ;;  %v2727_v54 = vmul.f32 0.2, %v6155_v38  ;;  %v6164_v57 = vadd.f32 %v1447_v39, %v7227_v42 }
 0x147   :  { %vm2697_vm6 = vcmp.gt.f32.partialorder %v6163_v4, 0.0  ;;  %v2729_v52 = vmul.f32 0.2, %v6163_v4  ;;  %vm2696_vm7 = vcmp.gt.f32.partialorder %v6156_v36, 0.0  ;;  %v2728_v53 = vmul.f32 0.2, %v6156_v36 }
 0x148   :  { %v7251_v58 = vsel %vm2695_vm5, %v6155_v38, %v2727_v54  ;;  %vm2698_vm8 = vcmp.gt.f32.partialorder %v6164_v57, 0.0  ;;  %v2730_v30 = vmul.f32 0.2, %v6164_v57  ;;  %v840_v61 = vpop.f32.mrb[2].mxu0  ;;  %v1452_v27 = vpop.f32.mrb[2].mxu1 }
 0x149   :  { %v8107_v48 = vand.u32 4294901760, %v7251_v58  ;;  %v7256_v49 = vsel %vm2697_vm6, %v6163_v4, %v2729_v52  ;;  %v7258_v29 = vsel %vm2696_vm7, %v6156_v36, %v2728_v53  ;;  %v6157_v32 = vadd.f32 %v840_v61, %v7249_v31  ;;  %v842_v59 = vpop.f32.mrb[3].mxu0  ;;  %v1454_v55 = vpop.f32.mrb[3].mxu1 }
 0x14a   :  { %v8105_v62 = vand.u32 4294901760, %v7256_v49  ;;  %v2832_v63 = vand.u32 4294901760, %v7258_v29  ;;  %v7263_v40 = vsel %vm2698_vm8, %v6164_v57, %v2730_v30  ;;  %v6165_v0 = vadd.f32 %v1452_v27, %v7249_v31 }
 0x14b   :  { %v7269_v5 = vsub.f32 %v7251_v58, %v8107_v48  ;;  %v8108_v41 = vand.u32 4294901760, %v7263_v40  ;;  %vm2703_vm9 = vcmp.gt.f32.partialorder %v6157_v32, 0.0  ;;  %v2735_v56 = vmul.f32 0.2, %v6157_v32  ;;  %v847_v6 = vpop.f32.mrb[4].mxu0 }
 0x14c   :  { %v7275_v7 = vsub.f32 %v7256_v49, %v8105_v62  ;;  %v7280_v8 = vsub.f32 %v7258_v29, %v2832_v63  ;;  %vm2705_vm10 = vcmp.gt.f32.partialorder %v6165_v0, 0.0  ;;  %v2737_v10 = vmul.f32 0.2, %v6165_v0  ;;  %v1459_v11 = vpop.f32.mrb[4].mxu1  ;;  %v849_v17 = vpop.f32.mrb[5].mxu0 }
 0x14d   :  { %v7286_v23 = vsub.f32 %v7263_v40, %v8108_v41  ;;  %v7288_v24 = vsel %vm2703_vm9, %v6157_v32, %v2735_v56  ;;  %v6158_v26 = vadd.f32 %v842_v59, %v7249_v31  ;;  %v1461_v35 = vpop.f32.mrb[5].mxu1  ;;  %v6166_v22 = vadd.f32 %v1454_v55, %v7249_v31 }
 0x14e   :  { %v8106_v20 = vand.u32 4294901760, %v7288_v24  ;;  %v7295_v2 = vsel %vm2705_vm10, %v6165_v0, %v2737_v10  ;;  %v6159_v25 = vadd.f32 %v847_v6, %v7291_v37  ;;  %v6167_v54 = vadd.f32 %v1459_v11, %v7291_v37  ;;  %v7313_v11 = vpop.permute.xlu1 %231 }
 0x14f   :  { %v8104_v38 = vand.u32 4294901760, %v7295_v2  ;;  %vm2704_vm11 = vcmp.gt.f32.partialorder %v6158_v26, 0.0  ;;  %v2736_v47 = vmul.f32 0.2, %v6158_v26  ;;  %v854_v4 = vpop.f32.mrb[6].mxu0  ;;  %vm2706_vm12 = vcmp.gt.f32.partialorder %v6166_v22, 0.0 }
 0x150   :  { %v7303_v36 = vsub.f32 %v7288_v24, %v8106_v20  ;;  %v2738_v39 = vmul.f32 0.2, %v6166_v22  ;;  %v1466_v57 = vpop.f32.mrb[6].mxu1  ;;  %v856_v52 = vpop.f32.mrb[7].mxu0  ;;  %vm2711_vm13 = vcmp.gt.f32.partialorder %v6159_v25, 0.0  ;;  %vm2713_vm14 = vcmp.gt.f32.partialorder %v6167_v54, 0.0 }
 0x151   :  { %v7309_v53 = vsub.f32 %v7295_v2, %v8104_v38  ;;  %v2768_v30 = vsel %vm2704_vm11, %v6158_v26, %v2736_v47  ;;  %v2743_v61 = vmul.f32 0.2, %v6159_v25  ;;  %v1468_v27 = vpop.f32.mrb[7].mxu1  ;;  %v2745_v10 = vmul.f32 0.2, %v6167_v54  ;;  %8127 = vst [vmem:[#allocation9_spill] sm:$0xff] %v7313_v11 }
 0x152   :  { %v2836_v59 = vand.u32 4294901760, %v2768_v30  ;;  %v2770_v55 = vsel %vm2706_vm12, %v6166_v22, %v2738_v39  ;;  %v6160_v26 = vadd.f32 %v849_v17, %v7291_v37  ;;  %v6168_v47 = vadd.f32 %v1461_v35, %v7291_v37 }
 0x153   :  { %v3526_v56 = vand.u32 4294901760, %v2770_v55  ;;  %v2775_v6 = vsel %vm2711_vm13, %v6159_v25, %v2743_v61  ;;  %v2777_v1 = vsel %vm2713_vm14, %v6167_v54, %v2745_v10  ;;  %v6161_v22 = vadd.f32 %v854_v4, %v7313_v11 }
 0x154   :  { %v7315_v28 = vsub.f32 %v2768_v30, %v2836_v59  ;;  %v2842_v9 = vand.u32 4294901760, %v2775_v6  ;;  %v6169_v39 = vadd.f32 %v1466_v57, %v7313_v11  ;;  %v3532_v25 = vand.u32 4294901760, %v2777_v1 }
 0x155   :  { %v7319_v60 = vsub.f32 %v2770_v55, %v3526_v56  ;;  %vm2712_vm15 = vcmp.gt.f32.partialorder %v6160_v26, 0.0  ;;  %v2744_v61 = vmul.f32 0.2, %v6160_v26  ;;  %vm2714_vm0 = vcmp.gt.f32.partialorder %v6168_v47, 0.0 }
 0x156   :  { %v7323_v0 = vsub.f32 %v2775_v6, %v2842_v9  ;;  %v2746_v30 = vmul.f32 0.2, %v6168_v47  ;;  %vm2719_vm1 = vcmp.gt.f32.partialorder %v6161_v22, 0.0  ;;  %v2751_v32 = vmul.f32 0.2, %v6161_v22 }
 0x157   :  { %v7326_v18 = vsub.f32 %v2777_v1, %v3532_v25  ;;  %v2776_v35 = vsel %vm2712_vm15, %v6160_v26, %v2744_v61  ;;  %vm2721_vm2 = vcmp.gt.f32.partialorder %v6169_v39, 0.0  ;;  %v2753_v10 = vmul.f32 0.2, %v6169_v39 }
 0x158   :  { %v2840_v54 = vand.u32 4294901760, %v2776_v35  ;;  %v2778_v55 = vsel %vm2714_vm0, %v6168_v47, %v2746_v30  ;;  %v2783_v4 = vsel %vm2719_vm1, %v6161_v22, %v2751_v32  ;;  %v6162_v62 = vadd.f32 %v856_v52, %v7313_v11 }
 0x159   :  { %v3530_v6 = vand.u32 4294901760, %v2778_v55  ;;  %v2846_v38 = vand.u32 4294901760, %v2783_v4  ;;  %v2785_v48 = vsel %vm2721_vm2, %v6169_v39, %v2753_v10  ;;  %v6170_v41 = vadd.f32 %v1468_v27, %v7313_v11 }
 0x15a   :  { %v7330_v20 = vsub.f32 %v2776_v35, %v2840_v54  ;;  %v7335_v1 = vpack.c.bf16 %v2836_v59, %v2832_v63  ;;  %v3536_v32 = vand.u32 4294901760, %v2785_v48  ;;  %vm2720_vm3 = vcmp.gt.f32.partialorder %v6162_v62, 0.0 }
 0x15b   :  { %v7337_v26 = vsub.f32 %v2778_v55, %v3530_v6  ;;  %v7339_v47 = vsub.f32 %v2783_v4, %v2846_v38  ;;  %v2752_v22 = vmul.f32 0.2, %v6162_v62  ;;  %vm2722_vm4 = vcmp.gt.f32.partialorder %v6170_v41, 0.0 }
 0x15c   :  { %v2754_v61 = vmul.f32 0.2, %v6170_v41  ;;  %5964 = vmatprep.subr.bf16.mxu0 %v7335_v1  ;;  %v8128_v52 = vand.u32 4294901760, %v7263_v40  ;;  %v7347_v29 = vsub.f32 %v2785_v48, %v3536_v32  ;;  %v8129_v63 = vand.u32 4294901760, %v7251_v58 }
 0x15d   :  { %v8130_v59 = vand.u32 4294901760, %v7288_v24  ;;  %v8131_v35 = vand.u32 4294901760, %v7256_v49  ;;  %v8132_v55 = vand.u32 4294901760, %v7295_v2  ;;  %v2784_v10 = vsel %vm2720_vm3, %v6162_v62, %v2752_v22 }
 0x15e   :  { %v7344_v39 = vpack.c.bf16 %v3526_v56, %v8128_v52  ;;  %v2786_v40 = vsel %vm2722_vm4, %v6170_v41, %v2754_v61  ;;  %v7362_v56 = vpack.c.bf16 %v2846_v38, %v2842_v9  ;;  %v7364_v48 = vpack.c.bf16 %v3536_v32, %v3532_v25 }
 0x15f   :  { %v7353_v30 = vpack.c.bf16 %v8130_v59, %v8129_v63  ;;  %v7359_v4 = vpack.c.bf16 %v8132_v55, %v8131_v35  ;;  %v2844_v52 = vand.u32 4294901760, %v2784_v10  ;;  %v3534_v24 = vand.u32 4294901760, %v2786_v40 }
 0x160   :  { %6012 = vmatprep.subr.bf16.mxu1 %v7344_v39  ;;  %v8112_v49 = vand.u32 4294901760, %v7280_v8  ;;  %v8111_v2 = vand.u32 4294901760, %v7315_v28  ;;  %v8110_v62 = vand.u32 4294901760, %v7286_v23  ;;  %v8109_v41 = vand.u32 4294901760, %v7319_v60 }
 0x161   :  { %5966 = vmatpush1.bf16.msra.mxu0 %v7353_v30  ;;  %6014 = vmatpush1.bf16.msra.mxu1 %v7359_v4  ;;  %v8133_v9 = vand.u32 4294901760, %v7269_v5  ;;  %v7376_v25 = vsub.f32 %v2784_v10, %v2844_v52  ;;  %v7378_v32 = vsub.f32 %v2786_v40, %v3534_v24  ;;  %v7380_v22 = vpack.c.bf16 %v2844_v52, %v2840_v54 }
 0x162   :  { %v7382_v61 = vpack.c.bf16 %v3534_v24, %v3530_v6  ;;  %v2952_v63 = vsub.f32 %v7280_v8, %v8112_v49  ;;  %v2964_v59 = vsub.f32 %v7315_v28, %v8111_v2  ;;  %v3642_v35 = vsub.f32 %v7286_v23, %v8110_v62 }
 0x163   :  { %v2958_v38 = vsub.f32 %v7269_v5, %v8133_v9  ;;  %v3654_v55 = vsub.f32 %v7319_v60, %v8109_v41  ;;  %5968 = vmatprep.subr.bf16.mxu0 %v7380_v22  ;;  %v8134_v6 = vand.u32 4294901760, %v7303_v36  ;;  %v8135_v40 = vand.u32 4294901760, %v7275_v7 }
 0x164   :  { %6016 = vmatprep.subr.bf16.mxu1 %v7382_v61  ;;  %v8136_v24 = vand.u32 4294901760, %v7309_v53  ;;  %v2953_v41 = vand.u32 4294901760, %v2952_v63  ;;  %v2965_v62 = vand.u32 4294901760, %v2964_v59  ;;  %v3643_v2 = vand.u32 4294901760, %v3642_v35 }
 0x165   :  { %v2959_v54 = vand.u32 4294901760, %v2958_v38  ;;  %v2970_v10 = vsub.f32 %v7303_v36, %v8134_v6  ;;  %v3648_v52 = vsub.f32 %v7275_v7, %v8135_v40  ;;  %5970 = vmatpush1.bf16.msra.mxu0 %v7362_v56  ;;  %6018 = vmatpush1.bf16.msra.mxu1 %v7364_v48  ;;  %v3655_v38 = vand.u32 4294901760, %v3654_v55 }
 0x166   :  { %v3660_v9 = vsub.f32 %v7309_v53, %v8136_v24  ;;  %v2975_v6 = vand.u32 4294901760, %v7330_v20  ;;  %v5971_v27 = vpack.c.bf16 %v2965_v62, %v2953_v41  ;;  %v2987_v40 = vand.u32 4294901760, %v7376_v25 }
 0x167   :  { %v2971_v49 = vand.u32 4294901760, %v2970_v10  ;;  %v3649_v58 = vand.u32 4294901760, %v3648_v52  ;;  %v6019_v17 = vpack.c.bf16 %v3655_v38, %v3643_v2  ;;  %v3665_v12 = vand.u32 4294901760, %v7337_v26 }
 0x168   :  { %v3661_v57 = vand.u32 4294901760, %v3660_v9  ;;  %2910 = vmatmul.mubr.f32.vlgmr.msra.gmra.mrb[16].mxu0 %v7242_v44  ;;  %3600 = vmatmul.mubr.f32.vlgmr.msra.gmra.mrb[16].mxu1 %v7242_v44  ;;  %v2976_v59 = vsub.f32 %v7330_v20, %v2975_v6  ;;  %v3677_v35 = vand.u32 4294901760, %v7378_v32  ;;  %v2988_v55 = vsub.f32 %v7376_v25, %v2987_v40 }
 0x169   :  { %v5973_v24 = vpack.c.bf16 %v2971_v49, %v2959_v54  ;;  %5972 = vmatprep.subr.bf16.mxu0 %v5971_v27  ;;  %6020 = vmatprep.subr.bf16.mxu1 %v6019_v17  ;;  %v3666_v2 = vsub.f32 %v7337_v26, %v3665_v12  ;;  %v8137_v62 = vand.u32 4294901760, %v7323_v0  ;;  %v8138_v10 = vsub.f32 %v7222_v15, %v7234_v21 }
 0x16a   :  { %v6021_v63 = vpack.c.bf16 %v3661_v57, %v3649_v58  ;;  %v2977_v57 = vand.u32 4294901760, %v2976_v59  ;;  %v3678_v58 = vsub.f32 %v7378_v32, %v3677_v35  ;;  %v8139_v17 = vand.u32 4294901760, %v7339_v47 }
 0x16b   :  { %v2982_v41 = vsub.f32 %v7323_v0, %v8137_v62  ;;  %v7424_v52 = vand.u32 4294901760, %v8138_v10  ;;  %5974 = vmatpush1.bf16.msra.mxu0 %v5973_v24  ;;  %v8140_v49 = vand.u32 4294901760, %v7326_v18  ;;  %v8141_v9 = vmov 0.0  }
 0x16c   :  { %6022 = vmatpush1.bf16.msra.mxu1 %v6021_v63  ;;  %v2994_v27 = vsub.f32 %v7339_v47, %v8139_v17  ;;  %2915 = vmatprep.mubr.f32.mxu0 %v8141_v9  ;;  %v2989_v38 = vand.u32 4294901760, %v2988_v55  ;;  %v3667_v62 = vand.u32 4294901760, %v3666_v2  ;;  %v8142_v24 = vand.u32 4294901760, %v7347_v29 }
 0x16d   :  { %v3672_v54 = vsub.f32 %v7326_v18, %v8140_v49  ;;  %3605 = vmatprep.mubr.f32.mxu1 %v8141_v9  ;;  %v2983_v10 = vand.u32 4294901760, %v2982_v41  ;;  %2921 = vmatmul.mubr.f32.gmra.mrb[18].mxu0 %v7244_v45  ;;  %v3679_v59 = vand.u32 4294901760, %v3678_v58  ;;  %v5979_v49 = vpack.c.bf16 %v7315_v28, %v7280_v8 }
 0x16e   :  { %v3684_v63 = vsub.f32 %v7347_v29, %v8142_v24  ;;  %3611 = vmatmul.mubr.f32.gmra.mrb[18].mxu1 %v7244_v45  ;;  %v2995_v17 = vand.u32 4294901760, %v2994_v27  ;;  %v5975_v44 = vpack.c.bf16 %v2989_v38, %v2977_v57  ;;  %v6027_v55 = vpack.c.bf16 %v7319_v60, %v7286_v23  ;;  %2926 = vmatprep.mubr.f32.mxu0 %v8141_v9 }
 0x16f   :  { %v3673_v46 = vand.u32 4294901760, %v3672_v54  ;;  %3616 = vmatprep.mubr.f32.mxu1 %v8141_v9  ;;  %v5981_v2 = vpack.c.bf16 %v7303_v36, %v7269_v5  ;;  %v6023_v41 = vpack.c.bf16 %v3679_v59, %v3667_v62  ;;  %v6029_v58 = vpack.c.bf16 %v7309_v53, %v7275_v7 }
 0x170   :  { %v3685_v11 = vand.u32 4294901760, %v3684_v63  ;;  %v5977_v24 = vpack.c.bf16 %v2995_v17, %v2983_v10  ;;  %v5983_v27 = vpack.c.bf16 %v7376_v25, %v7330_v20  ;;  %5976 = vmatprep.subr.bf16.mxu0 %v5975_v44  ;;  %v6031_v54 = vpack.c.bf16 %v7378_v32, %v7337_v26 }
 0x171   :  { %v5985_v38 = vpack.c.bf16 %v7339_v47, %v7323_v0  ;;  %v6033_v63 = vpack.c.bf16 %v7347_v29, %v7326_v18  ;;  %6024 = vmatprep.subr.bf16.mxu1 %v6023_v41  ;;  %v8143_v62 = vand.u32 4294901760, %v7280_v8  ;;  %v8144_v10 = vand.u32 4294901760, %v7315_v28  ;;  %2932 = vmatmul.mubr.f32.gmra.mrb[20].mxu0 %v7424_v52 }
 0x172   :  { %v6025_v57 = vpack.c.bf16 %v3685_v11, %v3673_v46  ;;  %5978 = vmatpush1.bf16.msra.mxu0 %v5977_v24  ;;  %v8145_v20 = vand.u32 4294901760, %v7286_v23  ;;  %v8146_v46 = vand.u32 4294901760, %v7319_v60  ;;  %v8147_v11 = vand.u32 4294901760, %v7269_v5  ;;  %3622 = vmatmul.mubr.f32.gmra.mrb[20].mxu1 %v7424_v52 }
 0x173   :  { %v5995_v59 = vpack.c.bf16 %v8144_v10, %v8143_v62  ;;  %v8148_v26 = vand.u32 4294901760, %v7303_v36  ;;  %5980 = vmatprep.subr.bf16.mxu0 %v5979_v49  ;;  %v8149_v32 = vand.u32 4294901760, %v7275_v7  ;;  %v8150_v8 = vand.u32 4294901760, %v7309_v53  ;;  %2937 = vmatprep.mubr.f32.mxu0 %v8141_v9 }
 0x174   :  { %v6043_v44 = vpack.c.bf16 %v8146_v46, %v8145_v20  ;;  %6026 = vmatpush1.bf16.msra.mxu1 %v6025_v57  ;;  %v7478_v28 = vpack.c.bf16 %v2987_v40, %v2975_v6  ;;  %v7480_v23 = vpack.c.bf16 %v3677_v35, %v3665_v12  ;;  %v8151_v60 = vsub.f32 %v7225_v19, %v7238_v43 }
 0x175   :  { %v7470_v25 = vpack.c.bf16 %v8148_v26, %v8147_v11  ;;  %v7476_v17 = vpack.c.bf16 %v8150_v8, %v8149_v32  ;;  %6028 = vmatprep.subr.bf16.mxu1 %v6027_v55  ;;  %v8152_v36 = vand.u32 4294901760, %v7323_v0  ;;  %v8153_v7 = vand.u32 4294901760, %v7339_v47  ;;  %3627 = vmatprep.mubr.f32.mxu1 %v8141_v9 }
 0x176   :  { %v7486_v5 = vand.u32 4294901760, %v8151_v60  ;;  %v8154_v53 = vand.u32 4294901760, %v7326_v18  ;;  %v8155_v6 = vand.u32 4294901760, %v7347_v29 }
 0x177   :  { %v7492_v49 = vpack.c.bf16 %v8153_v7, %v8152_v36 }
 0x178   :  { %v7498_v12 = vpack.c.bf16 %v8155_v6, %v8154_v53  ;;  %2943 = vmatmul.mubr.f32.gmra.mrb[22].mxu0 %v7486_v5  ;;  %3633 = vmatmul.mubr.f32.gmra.mrb[22].mxu1 %v7486_v5 }
 0x179   :  { %3053 = vmatprep.mubr.f32.mxu0 %v8141_v9  ;;  %3743 = vmatprep.mubr.f32.mxu1 %v8141_v9 }
 0x17c   :  { %3055 = vmatmul.mubr.f32.vlgmr.msra.gmra.mrb[16].mxu0 %v7198_v33  ;;  %3745 = vmatmul.mubr.f32.vlgmr.msra.gmra.mrb[16].mxu1 %v7198_v33 }
 0x17d   :  { %5982 = vmatpush1.bf16.msra.mxu0 %v5981_v2  ;;  %6030 = vmatpush1.bf16.msra.mxu1 %v6029_v58 }
 0x17e   :  { %5984 = vmatprep.subr.bf16.mxu0 %v5983_v27  ;;  %6032 = vmatprep.subr.bf16.mxu1 %v6031_v54 }
 0x17f   :  { %3060 = vmatprep.mubr.f32.mxu0 %v8141_v9  ;;  %3750 = vmatprep.mubr.f32.mxu1 %v8141_v9 }
 0x180   :  { %3062 = vmatmul.mubr.f32.gmra.mrb[18].mxu0 %v7200_v34  ;;  %3752 = vmatmul.mubr.f32.gmra.mrb[18].mxu1 %v7200_v34 }
 0x181   :  { %5986 = vmatpush1.bf16.msra.mxu0 %v5985_v38  ;;  %6034 = vmatpush1.bf16.msra.mxu1 %v6033_v63 }
 0x182   :  { %5988 = vmatprep.subr.bf16.mxu0 %v7335_v1  ;;  %6036 = vmatprep.subr.bf16.mxu1 %v7344_v39 }
 0x183   :  { %3067 = vmatprep.mubr.f32.mxu0 %v8141_v9  ;;  %3757 = vmatprep.mubr.f32.mxu1 %v8141_v9 }
 0x184   :  { %3069 = vmatmul.mubr.f32.gmra.mrb[20].mxu0 %v7211_v3  ;;  %3759 = vmatmul.mubr.f32.gmra.mrb[20].mxu1 %v7211_v3 }
 0x185   :  { %3074 = vmatprep.mubr.f32.mxu0 %v8141_v9  ;;  %3764 = vmatprep.mubr.f32.mxu1 %v8141_v9 }
 0x188   :  { %3076 = vmatmul.mubr.f32.gmra.mrb[22].mxu0 %v7213_v16  ;;  %3766 = vmatmul.mubr.f32.gmra.mrb[22].mxu1 %v7213_v16 }
 0x189   :  { %3162 = vmatprep.mubr.f32.mxu0 %v8141_v9  ;;  %3852 = vmatprep.mubr.f32.mxu1 %v8141_v9 }
 0x18c   :  { %3165 = vmatmul.mubr.f32.vlgmr.msra.gmra.mrb[16].mxu0 %v7206_v50  ;;  %3855 = vmatmul.mubr.f32.vlgmr.msra.gmra.mrb[16].mxu1 %v7206_v50 }
 0x18d   :  { %5990 = vmatpush1.bf16.msra.mxu0 %v7353_v30  ;;  %6038 = vmatpush1.bf16.msra.mxu1 %v7359_v4 }
 0x18e   :  { %5992 = vmatprep.subr.bf16.mxu0 %v7380_v22  ;;  %6040 = vmatprep.subr.bf16.mxu1 %v7382_v61 }
 0x18f   :  { %3170 = vmatprep.mubr.f32.mxu0 %v8141_v9  ;;  %3860 = vmatprep.mubr.f32.mxu1 %v8141_v9 }
 0x190   :  { %3173 = vmatmul.mubr.f32.gmra.mrb[18].mxu0 %v7209_v51  ;;  %3863 = vmatmul.mubr.f32.gmra.mrb[18].mxu1 %v7209_v51 }
 0x191   :  { %5994 = vmatpush1.bf16.msra.mxu0 %v7362_v56  ;;  %6042 = vmatpush1.bf16.msra.mxu1 %v7364_v48 }
 0x192   :  { %5996 = vmatprep.subr.bf16.mxu0 %v5995_v59  ;;  %6044 = vmatprep.subr.bf16.mxu1 %v6043_v44 }
 0x193   :  { %3178 = vmatprep.mubr.f32.mxu0 %v8141_v9  ;;  %3868 = vmatprep.mubr.f32.mxu1 %v8141_v9 }
 0x194   :  { %3181 = vmatmul.mubr.f32.gmra.mrb[20].mxu0 %v7222_v15  ;;  %3871 = vmatmul.mubr.f32.gmra.mrb[20].mxu1 %v7222_v15 }
 0x195   :  { %3186 = vmatprep.mubr.f32.mxu0 %v8141_v9  ;;  %3876 = vmatprep.mubr.f32.mxu1 %v8141_v9 }
 0x198   :  { %3189 = vmatmul.mubr.f32.gmra.mrb[22].mxu0 %v7225_v19  ;;  %3879 = vmatmul.mubr.f32.gmra.mrb[22].mxu1 %v7225_v19 }
 0x199   :  { %3267 = vmatprep.mubr.f32.mxu0 %v8141_v9  ;;  %3957 = vmatprep.mubr.f32.mxu1 %v8141_v9 }
 0x19c   :  { %3271 = vmatmul.mubr.f32.vlgmr.msra.gmra.mrb[16].mxu0 %v7216_v13  ;;  %3961 = vmatmul.mubr.f32.vlgmr.msra.gmra.mrb[16].mxu1 %v7216_v13 }
 0x19d   :  { %5998 = vmatpush1.bf16.msra.mxu0 %v7470_v25  ;;  %6046 = vmatpush1.bf16.msra.mxu1 %v7476_v17 }
 0x19e   :  { %6000 = vmatprep.subr.bf16.mxu0 %v7478_v28  ;;  %6048 = vmatprep.subr.bf16.mxu1 %v7480_v23 }
 0x19f   :  { %3276 = vmatprep.mubr.f32.mxu0 %v8141_v9  ;;  %3966 = vmatprep.mubr.f32.mxu1 %v8141_v9 }
 0x1a0   :  { %3280 = vmatmul.mubr.f32.gmra.mrb[18].mxu0 %v7219_v14  ;;  %3970 = vmatmul.mubr.f32.gmra.mrb[18].mxu1 %v7219_v14 }
 0x1a1   :  { %6002 = vmatpush1.bf16.msra.mxu0 %v7492_v49  ;;  %6050 = vmatpush1.bf16.msra.mxu1 %v7498_v12 }
 0x1a2   :  { %6004 = vmatprep.subr.bf16.mxu0 %v7335_v1  ;;  %6052 = vmatprep.subr.bf16.mxu1 %v7344_v39 }
 0x1a3   :  { %3285 = vmatprep.mubr.f32.mxu0 %v8141_v9  ;;  %3975 = vmatprep.mubr.f32.mxu1 %v8141_v9  ;;  %v2057_v18 = vpop.f32.mrb[8].mxu0 }
 0x1a4   :  { %3289 = vmatmul.mubr.f32.gmra.mrb[20].mxu0 %v7234_v21  ;;  %3979 = vmatmul.mubr.f32.gmra.mrb[20].mxu1 %v7234_v21  ;;  %v6171_v0 = vadd.f32 %v2057_v18, %v7227_v42  ;;  %v2669_v47 = vpop.f32.mrb[8].mxu1  ;;  %v2059_v29 = vpop.f32.mrb[9].mxu0 }
 0x1a5   :  { %3294 = vmatprep.mubr.f32.mxu0 %v8141_v9  ;;  %3984 = vmatprep.mubr.f32.mxu1 %v8141_v9  ;;  %v6179_v1 = vadd.f32 %v2669_v47, %v7227_v42  ;;  %v6172_v39 = vadd.f32 %v2059_v29, %v7227_v42  ;;  %v2671_v40 = vpop.f32.mrb[9].mxu1 }
 0x1a6   :  { %vm2699_vm5 = vcmp.gt.f32.partialorder %v6171_v0, 0.0  ;;  %v2731_v35 = vmul.f32 0.2, %v6171_v0  ;;  %v6180_v55 = vadd.f32 %v2671_v40, %v7227_v42 }
 0x1a7   :  { %vm2701_vm6 = vcmp.gt.f32.partialorder %v6179_v1, 0.0  ;;  %v2733_v2 = vmul.f32 0.2, %v6179_v1  ;;  %vm2700_vm7 = vcmp.gt.f32.partialorder %v6172_v39, 0.0  ;;  %v2732_v41 = vmul.f32 0.2, %v6172_v39 }
 0x1a8   :  { %3298 = vmatmul.mubr.f32.gmra.mrb[22].mxu0 %v7238_v43  ;;  %3988 = vmatmul.mubr.f32.gmra.mrb[22].mxu1 %v7238_v43  ;;  %v7575_v24 = vsel %vm2699_vm5, %v6171_v0, %v2731_v35  ;;  %vm2702_vm8 = vcmp.gt.f32.partialorder %v6180_v55, 0.0  ;;  %v2734_v58 = vmul.f32 0.2, %v6180_v55  ;;  %v2064_v27 = vpop.f32.mrb[10].mxu0  ;;  %v2676_v57 = vpop.f32.mrb[10].mxu1 }
 0x1a9   :  { %3392 = vmatprep.mubr.f32.mxu0 %v8141_v9  ;;  %4082 = vmatprep.mubr.f32.mxu1 %v8141_v9  ;;  %v4214_v54 = vand.u32 4294901760, %v7575_v24  ;;  %v7578_v38 = vsel %vm2701_vm6, %v6179_v1, %v2733_v2  ;;  %v7580_v42 = vsel %vm2700_vm7, %v6172_v39, %v2732_v41  ;;  %v6173_v63 = vadd.f32 %v2064_v27, %v7249_v31  ;;  %v2066_v62 = vpop.f32.mrb[11].mxu0  ;;  %v2678_v10 = vpop.f32.mrb[11].mxu1 }
 0x1aa   :  { %v4904_v59 = vand.u32 4294901760, %v7578_v38  ;;  %v4212_v20 = vand.u32 4294901760, %v7580_v42  ;;  %v7586_v46 = vsel %vm2702_vm8, %v6180_v55, %v2734_v58  ;;  %v6181_v44 = vadd.f32 %v2676_v57, %v7249_v31 }
 0x1ab   :  { %v7594_v11 = vsub.f32 %v7575_v24, %v4214_v54  ;;  %v4902_v26 = vand.u32 4294901760, %v7586_v46  ;;  %vm2707_vm9 = vcmp.gt.f32.partialorder %v6173_v63, 0.0  ;;  %v2739_v25 = vmul.f32 0.2, %v6173_v63  ;;  %v2071_v32 = vpop.f32.mrb[12].mxu0 }
 0x1ac   :  { %3394 = vmatmul.mubr.f32.vlgmr.msra.gmra.mrb[16].mxu0 %v7198_v33  ;;  %4084 = vmatmul.mubr.f32.vlgmr.msra.gmra.mrb[16].mxu1 %v7198_v33  ;;  %v7607_v8 = vsub.f32 %v7580_v42, %v4212_v20  ;;  %vm2709_vm10 = vcmp.gt.f32.partialorder %v6181_v44, 0.0  ;;  %v2741_v17 = vmul.f32 0.2, %v6181_v44  ;;  %v2683_v28 = vpop.f32.mrb[12].mxu1  ;;  %v2073_v23 = vpop.f32.mrb[13].mxu0  ;;  %v6174_v36 = vadd.f32 %v2066_v62, %v7249_v31 }
 0x1ad   :  { %6006 = vmatpush1.bf16.msra.mxu0 %v7353_v30  ;;  %6054 = vmatpush1.bf16.msra.mxu1 %v7359_v4  ;;  %v7602_v30 = vsub.f32 %v7578_v38, %v4904_v59  ;;  %v7617_v60 = vsel %vm2707_vm9, %v6173_v63, %v2739_v25  ;;  %v2685_v7 = vpop.f32.mrb[13].mxu1  ;;  %v6182_v6 = vadd.f32 %v2678_v10, %v7249_v31 }
 0x1ae   :  { %6008 = vmatprep.subr.bf16.mxu0 %v7380_v22  ;;  %6056 = vmatprep.subr.bf16.mxu1 %v7382_v61  ;;  %v7615_v22 = vsub.f32 %v7586_v46, %v4902_v26  ;;  %v4218_v49 = vand.u32 4294901760, %v7617_v60  ;;  %v7624_v53 = vsel %vm2709_vm10, %v6181_v44, %v2741_v17  ;;  %vm2708_vm11 = vcmp.gt.f32.partialorder %v6174_v36, 0.0 }
 0x1af   :  { %3399 = vmatprep.mubr.f32.mxu0 %v8141_v9  ;;  %4089 = vmatprep.mubr.f32.mxu1 %v8141_v9  ;;  %v4908_v12 = vand.u32 4294901760, %v7624_v53  ;;  %v2740_v18 = vmul.f32 0.2, %v6174_v36  ;;  %v6175_v0 = vadd.f32 %v2071_v32, %v7291_v37  ;;  %v2078_v47 = vpop.f32.mrb[14].mxu0  ;;  %vm2710_vm12 = vcmp.gt.f32.partialorder %v6182_v6, 0.0 }
 0x1b0   :  { %3401 = vmatmul.mubr.f32.gmra.mrb[18].mxu0 %v7200_v34  ;;  %4091 = vmatmul.mubr.f32.gmra.mrb[18].mxu1 %v7200_v34  ;;  %v7636_v29 = vsub.f32 %v7617_v60, %v4218_v49  ;;  %v2742_v31 = vmul.f32 0.2, %v6182_v6  ;;  %v2690_v1 = vpop.f32.mrb[14].mxu1  ;;  %v2080_v39 = vpop.f32.mrb[15].mxu0  ;;  %v6176_v25 = vadd.f32 %v2073_v23, %v7291_v37  ;;  %v6184_v32 = vadd.f32 %v2685_v7, %v7291_v37 }
 0x1b1   :  { %6010 = vmatpush1.bf16.msra.mxu0 %v7362_v56  ;;  %6058 = vmatpush1.bf16.msra.mxu1 %v7364_v48  ;;  %v6183_v56 = vadd.f32 %v2683_v28, %v7291_v37  ;;  %v7643_v40 = vsub.f32 %v7624_v53, %v4908_v12  ;;  %v7645_v48 = vsel %vm2708_vm11, %v6174_v36, %v2740_v18  ;;  %vm2715_vm13 = vcmp.gt.f32.partialorder %v6175_v0, 0.0  ;;  %v2692_v55 = vpop.f32.mrb[15].mxu1  ;;  %v8156_v36 = vld [vmem:[#allocation9_spill] sm:$0xff] }
 0x1b2   :  { %3406 = vmatprep.mubr.f32.mxu0 %v8141_v9  ;;  %4096 = vmatprep.mubr.f32.mxu1 %v8141_v9  ;;  %v2747_v35 = vmul.f32 0.2, %v6175_v0  ;;  %v4216_v41 = vand.u32 4294901760, %v7645_v48  ;;  %v2774_v58 = vsel %vm2710_vm12, %v6182_v6, %v2742_v31  ;;  %v6177_v6 = vadd.f32 %v2078_v47, %v8156_v36 }
 0x1b3   :  { %vm2717_vm14 = vcmp.gt.f32.partialorder %v6183_v56, 0.0  ;;  %v4906_v57 = vand.u32 4294901760, %v2774_v58  ;;  %v2749_v62 = vmul.f32 0.2, %v6183_v56  ;;  %v6185_v18 = vadd.f32 %v2690_v1, %v8156_v36 }
 0x1b4   :  { %3408 = vmatmul.mubr.f32.gmra.mrb[20].mxu0 %v7211_v3  ;;  %4098 = vmatmul.mubr.f32.gmra.mrb[20].mxu1 %v7211_v3  ;;  %v7653_v63 = vsel %vm2715_vm13, %v6175_v0, %v2747_v35  ;;  %v7656_v10 = vsub.f32 %v7645_v48, %v4216_v41  ;;  %vm2716_vm15 = vcmp.gt.f32.partialorder %v6176_v25, 0.0  ;;  %v2748_v23 = vmul.f32 0.2, %v6176_v25 }
 0x1b5   :  { %3413 = vmatprep.mubr.f32.mxu0 %v8141_v9  ;;  %4103 = vmatprep.mubr.f32.mxu1 %v8141_v9  ;;  %v4222_v44 = vand.u32 4294901760, %v7653_v63  ;;  %v7662_v17 = vsub.f32 %v2774_v58, %v4906_v57  ;;  %v7664_v28 = vsel %vm2717_vm14, %v6183_v56, %v2749_v62  ;;  %vm2718_vm0 = vcmp.gt.f32.partialorder %v6184_v32, 0.0 }
 0x1b6   :  { %v4912_v31 = vand.u32 4294901760, %v7664_v28  ;;  %v2750_v37 = vmul.f32 0.2, %v6184_v32  ;;  %vm2723_vm1 = vcmp.gt.f32.partialorder %v6177_v6, 0.0  ;;  %v2755_v7 = vmul.f32 0.2, %v6177_v6 }
 0x1b7   :  { %v7672_v0 = vsub.f32 %v7653_v63, %v4222_v44  ;;  %v2780_v1 = vsel %vm2716_vm15, %v6176_v25, %v2748_v23  ;;  %vm2725_vm2 = vcmp.gt.f32.partialorder %v6185_v18, 0.0  ;;  %v2757_v62 = vmul.f32 0.2, %v6185_v18 }
 0x1b8   :  { %3415 = vmatmul.mubr.f32.gmra.mrb[22].mxu0 %v7213_v16  ;;  %4105 = vmatmul.mubr.f32.gmra.mrb[22].mxu1 %v7213_v16  ;;  %v7679_v56 = vsub.f32 %v7664_v28, %v4912_v31  ;;  %v4220_v48 = vand.u32 4294901760, %v2780_v1  ;;  %v2782_v35 = vsel %vm2718_vm0, %v6184_v32, %v2750_v37  ;;  %v2787_v58 = vsel %vm2723_vm1, %v6177_v6, %v2755_v7 }
 0x1b9   :  { %3493 = vmatprep.mubr.f32.mxu0 %v8141_v9  ;;  %4183 = vmatprep.mubr.f32.mxu1 %v8141_v9  ;;  %v4910_v61 = vand.u32 4294901760, %v2782_v35  ;;  %v4226_v2 = vand.u32 4294901760, %v2787_v58  ;;  %v6178_v4 = vadd.f32 %v2080_v39, %v8156_v36  ;;  %v2789_v25 = vsel %vm2725_vm2, %v6185_v18, %v2757_v62 }
 0x1ba   :  { %v5051_v27 = vand.u32 4294901760, %v7679_v56  ;;  %v7685_v47 = vsub.f32 %v2780_v1, %v4220_v48  ;;  %v6186_v28 = vadd.f32 %v2692_v55, %v8156_v36  ;;  %v4331_v32 = vand.u32 4294901760, %v7607_v8 }
 0x1bb   :  { %v7691_v6 = vsub.f32 %v2782_v35, %v4910_v61  ;;  %v7693_v23 = vsub.f32 %v2787_v58, %v4226_v2  ;;  %v4916_v37 = vand.u32 4294901760, %v2789_v25  ;;  %vm2724_vm3 = vcmp.gt.f32.partialorder %v6178_v4, 0.0 }
 0x1bc   :  { %3495 = vmatmul.mubr.f32.vlgmr.msra.gmra.mrb[16].mxu0 %v7198_v33  ;;  %4185 = vmatmul.mubr.f32.vlgmr.msra.gmra.mrb[16].mxu1 %v7198_v33  ;;  %v2756_v39 = vmul.f32 0.2, %v6178_v4  ;;  %vm2726_vm4 = vcmp.gt.f32.partialorder %v6186_v28, 0.0  ;;  %v2758_v7 = vmul.f32 0.2, %v6186_v28  ;;  %v7698_v18 = vpack.c.bf16 %v4216_v41, %v4212_v20 }
 0x1bd   :  { %3500 = vmatprep.mubr.f32.mxu0 %v8141_v9  ;;  %4190 = vmatprep.mubr.f32.mxu1 %v8141_v9  ;;  %v8122_v55 = vand.u32 4294901760, %v7693_v23  ;;  %v7701_v36 = vsub.f32 %v2789_v25, %v4916_v37  ;;  %v7706_v1 = vpack.c.bf16 %v4906_v57, %v4902_v26  ;;  %v7712_v35 = vpack.c.bf16 %v4218_v49, %v4214_v54 }
 0x1be   :  { %v2788_v58 = vsel %vm2724_vm3, %v6178_v4, %v2756_v39  ;;  %v2790_v42 = vsel %vm2726_vm4, %v6186_v28, %v2758_v7  ;;  %6060 = vmatprep.subr.bf16.mxu0 %v7698_v18  ;;  %v7720_v20 = vpack.c.bf16 %v4908_v12, %v4904_v59  ;;  %v8123_v46 = vand.u32 4294901760, %v7656_v10 }
 0x1bf   :  { %v5063_v24 = vand.u32 4294901760, %v7701_v36  ;;  %v4224_v26 = vand.u32 4294901760, %v2788_v58  ;;  %v4914_v60 = vand.u32 4294901760, %v2790_v42  ;;  %6108 = vmatprep.subr.bf16.mxu1 %v7706_v1  ;;  %6062 = vmatpush1.bf16.msra.mxu0 %v7712_v35  ;;  %v7728_v54 = vpack.c.bf16 %v4226_v2, %v4222_v44 }
 0x1c0   :  { %3502 = vmatmul.mubr.f32.gmra.mrb[18].mxu0 %v7200_v34  ;;  %4192 = vmatmul.mubr.f32.gmra.mrb[18].mxu1 %v7200_v34  ;;  %v7732_v38 = vpack.c.bf16 %v4916_v37, %v4912_v31  ;;  %v4332_v59 = vsub.f32 %v7607_v8, %v4331_v32  ;;  %v4344_v4 = vsub.f32 %v7656_v10, %v8123_v46  ;;  %v8121_v49 = vand.u32 4294901760, %v7615_v22 }
 0x1c1   :  { %6110 = vmatpush1.bf16.msra.mxu1 %v7720_v20  ;;  %3507 = vmatprep.mubr.f32.mxu0 %v8141_v9  ;;  %v7741_v53 = vsub.f32 %v2788_v58, %v4224_v26  ;;  %v7743_v12 = vsub.f32 %v2790_v42, %v4914_v60  ;;  %v7747_v2 = vpack.c.bf16 %v4224_v26, %v4220_v48  ;;  %v8120_v41 = vand.u32 4294901760, %v7662_v17 }
 0x1c2   :  { %4197 = vmatprep.mubr.f32.mxu1 %v8141_v9  ;;  %v7752_v57 = vpack.c.bf16 %v4914_v60, %v4910_v61  ;;  %v4333_v63 = vand.u32 4294901760, %v4332_v59  ;;  %v4345_v44 = vand.u32 4294901760, %v4344_v4  ;;  %v5022_v31 = vsub.f32 %v7615_v22, %v8121_v49 }
 0x1c3   :  { %6064 = vmatprep.subr.bf16.mxu0 %v7747_v2  ;;  %v5034_v48 = vsub.f32 %v7662_v17, %v8120_v41  ;;  %v8157_v62 = vand.u32 4294901760, %v7594_v11  ;;  %v8158_v61 = vand.u32 4294901760, %v7636_v29  ;;  %v8119_v37 = vand.u32 4294901760, %v7685_v47 }
 0x1c4   :  { %3509 = vmatmul.mubr.f32.gmra.mrb[20].mxu0 %v7211_v3  ;;  %4199 = vmatmul.mubr.f32.gmra.mrb[20].mxu1 %v7211_v3  ;;  %v6067_v39 = vpack.c.bf16 %v4345_v44, %v4333_v63  ;;  %v5023_v7 = vand.u32 4294901760, %v5022_v31  ;;  %v8159_v58 = vand.u32 4294901760, %v7602_v30  ;;  %v8160_v26 = vand.u32 4294901760, %v7643_v40 }
 0x1c5   :  { %3514 = vmatprep.mubr.f32.mxu0 %v8141_v9  ;;  %4204 = vmatprep.mubr.f32.mxu1 %v8141_v9  ;;  %v4338_v25 = vsub.f32 %v7594_v11, %v8157_v62  ;;  %v4350_v28 = vsub.f32 %v7636_v29, %v8158_v61  ;;  %v5035_v59 = vand.u32 4294901760, %v5034_v48  ;;  %v4356_v63 = vsub.f32 %v7685_v47, %v8119_v37 }
 0x1c6   :  { %6112 = vmatprep.subr.bf16.mxu1 %v7752_v57  ;;  %6066 = vmatpush1.bf16.msra.mxu0 %v7728_v54  ;;  %v5028_v42 = vsub.f32 %v7602_v30, %v8159_v58  ;;  %v5040_v60 = vsub.f32 %v7643_v40, %v8160_v26  ;;  %v4367_v61 = vand.u32 4294901760, %v7741_v53  ;;  %v5045_v58 = vand.u32 4294901760, %v7691_v6 }
 0x1c7   :  { %6114 = vmatpush1.bf16.msra.mxu1 %v7732_v38  ;;  %v4339_v4 = vand.u32 4294901760, %v4338_v25  ;;  %v4351_v62 = vand.u32 4294901760, %v4350_v28  ;;  %6068 = vmatprep.subr.bf16.mxu0 %v6067_v39  ;;  %v6115_v26 = vpack.c.bf16 %v5035_v59, %v5023_v7  ;;  %v5057_v25 = vand.u32 4294901760, %v7743_v12 }
 0x1c8   :  { %3516 = vmatmul.mubr.f32.gmra.mrb[22].mxu0 %v7213_v16  ;;  %4206 = vmatmul.mubr.f32.gmra.mrb[22].mxu1 %v7213_v16  ;;  %v5029_v44 = vand.u32 4294901760, %v5028_v42  ;;  %v5041_v31 = vand.u32 4294901760, %v5040_v60  ;;  %v4368_v37 = vsub.f32 %v7741_v53, %v4367_v61  ;;  %v5046_v41 = vsub.f32 %v7691_v6, %v5045_v58  ;;  %v8162_v60 = vld [vmem:[#allocation8_spill] sm:$0xff] }
 0x1c9   :  { %4284 = vmatprep.mubr.f32.mxu0 %v8141_v9  ;;  %4974 = vmatprep.mubr.f32.mxu1 %v8141_v9  ;;  %v6069_v48 = vpack.c.bf16 %v4351_v62, %v4339_v4  ;;  %v8161_v39 = vand.u32 4294901760, %v7672_v0  ;;  %v4357_v7 = vand.u32 4294901760, %v4356_v63  ;;  %v5058_v59 = vsub.f32 %v7743_v12, %v5057_v25 }
 0x1ca   :  { %v6117_v28 = vpack.c.bf16 %v5041_v31, %v5029_v44  ;;  %6116 = vmatprep.subr.bf16.mxu1 %v6115_v26  ;;  %v4374_v4 = vsub.f32 %v7693_v23, %v8122_v55  ;;  %v5052_v62 = vsub.f32 %v7679_v56, %v5051_v27  ;;  %v4369_v44 = vand.u32 4294901760, %v4368_v37 }
 0x1cb   :  { %v4362_v42 = vsub.f32 %v7672_v0, %v8161_v39  ;;  %v5047_v31 = vand.u32 4294901760, %v5046_v41  ;;  %v5064_v63 = vsub.f32 %v7701_v36, %v5063_v24  ;;  %v5059_v26 = vand.u32 4294901760, %v5058_v59 }
 0x1cc   :  { %4290 = vmatmul.mubr.f32.vlgmr.msra.gmra.mrb[24].mxu0 %v8162_v60  ;;  %4980 = vmatmul.mubr.f32.vlgmr.msra.gmra.mrb[24].mxu1 %v8162_v60  ;;  %v4375_v49 = vand.u32 4294901760, %v4374_v4  ;;  %v5053_v55 = vand.u32 4294901760, %v5052_v62  ;;  %v6075_v46 = vpack.c.bf16 %v7656_v10, %v7607_v8  ;;  %v6071_v60 = vpack.c.bf16 %v4369_v44, %v4357_v7 }
 0x1cd   :  { %6070 = vmatpush1.bf16.msra.mxu0 %v6069_v48  ;;  %v4363_v39 = vand.u32 4294901760, %v4362_v42  ;;  %6118 = vmatpush1.bf16.msra.mxu1 %v6117_v28  ;;  %v5065_v48 = vand.u32 4294901760, %v5064_v63  ;;  %v6123_v41 = vpack.c.bf16 %v7662_v17, %v7615_v22  ;;  %v6077_v37 = vpack.c.bf16 %v7636_v29, %v7594_v11 }
 0x1ce   :  { %4295 = vmatprep.mubr.f32.mxu0 %v8141_v9  ;;  %4985 = vmatprep.mubr.f32.mxu1 %v8141_v9  ;;  %v6119_v28 = vpack.c.bf16 %v5059_v26, %v5047_v31  ;;  %v6125_v59 = vpack.c.bf16 %v7643_v40, %v7602_v30  ;;  %v6079_v4 = vpack.c.bf16 %v7741_v53, %v7685_v47  ;;  %v8163_v31 = vand.u32 4294901760, %v7656_v10 }
 0x1cf   :  { %v6073_v42 = vpack.c.bf16 %v4375_v49, %v4363_v39  ;;  %6072 = vmatprep.subr.bf16.mxu0 %v6071_v60  ;;  %v6121_v7 = vpack.c.bf16 %v5065_v48, %v5053_v55  ;;  %v6127_v62 = vpack.c.bf16 %v7743_v12, %v7691_v6  ;;  %v6081_v44 = vpack.c.bf16 %v7693_v23, %v7672_v0 }
 0x1d0   :  { %4301 = vmatmul.mubr.f32.gmra.mrb[26].mxu0 %v7244_v45  ;;  %4991 = vmatmul.mubr.f32.gmra.mrb[26].mxu1 %v7244_v45  ;;  %v6129_v49 = vpack.c.bf16 %v7701_v36, %v7679_v56  ;;  %v6091_v53 = vpack.c.bf16 %v8163_v31, %v4331_v32  ;;  %v8164_v39 = vand.u32 4294901760, %v7615_v22  ;;  %v8165_v45 = vand.u32 4294901760, %v7662_v17 }
 0x1d1   :  { %6120 = vmatprep.subr.bf16.mxu1 %v6119_v28  ;;  %6074 = vmatpush1.bf16.msra.mxu0 %v6073_v42  ;;  %v8166_v6 = vand.u32 4294901760, %v7594_v11  ;;  %v8167_v12 = vand.u32 4294901760, %v7636_v29  ;;  %v8168_v26 = vand.u32 4294901760, %v7602_v30  ;;  %v8169_v8 = vand.u32 4294901760, %v7643_v40 }
 0x1d2   :  { %v6139_v55 = vpack.c.bf16 %v8165_v45, %v8164_v39  ;;  %6122 = vmatpush1.bf16.msra.mxu1 %v6121_v7  ;;  %6076 = vmatprep.subr.bf16.mxu0 %v6075_v46  ;;  %v8170_v10 = vand.u32 4294901760, %v7685_v47  ;;  %v7850_v17 = vpack.c.bf16 %v5057_v25, %v5045_v58  ;;  %v8171_v11 = vand.u32 4294901760, %v7672_v0 }
 0x1d3   :  { %v7837_v63 = vpack.c.bf16 %v8167_v12, %v8166_v6  ;;  %v7843_v60 = vpack.c.bf16 %v8169_v8, %v8168_v26  ;;  %6124 = vmatprep.subr.bf16.mxu1 %v6123_v41  ;;  %4306 = vmatprep.mubr.f32.mxu0 %v8141_v9  ;;  %v8172_v29 = vand.u32 4294901760, %v7693_v23  ;;  %v7862_v30 = vpack.c.bf16 %v5063_v24, %v5051_v27 }
 0x1d4   :  { %v7847_v22 = vpack.c.bf16 %v4367_v61, %v8170_v10  ;;  %4996 = vmatprep.mubr.f32.mxu1 %v8141_v9  ;;  %4312 = vmatmul.mubr.f32.gmra.mrb[28].mxu0 %v7424_v52 }
 0x1d5   :  { %v7856_v32 = vpack.c.bf16 %v8172_v29, %v8171_v11  ;;  %5002 = vmatmul.mubr.f32.gmra.mrb[28].mxu1 %v7424_v52  ;;  %4317 = vmatprep.mubr.f32.mxu0 %v8141_v9 }
 0x1d6   :  { %5007 = vmatprep.mubr.f32.mxu1 %v8141_v9 }
 0x1d8   :  { %4323 = vmatmul.mubr.f32.gmra.mrb[30].mxu0 %v7486_v5 }
 0x1d9   :  { %5013 = vmatmul.mubr.f32.gmra.mrb[30].mxu1 %v7486_v5  ;;  %4433 = vmatprep.mubr.f32.mxu0 %v8141_v9 }
 0x1da   :  { %5123 = vmatprep.mubr.f32.mxu1 %v8141_v9 }
 0x1dc   :  { %4435 = vmatmul.mubr.f32.vlgmr.msra.gmra.mrb[24].mxu0 %v7198_v33 }
 0x1dd   :  { %6078 = vmatpush1.bf16.msra.mxu0 %v6077_v37  ;;  %5125 = vmatmul.mubr.f32.vlgmr.msra.gmra.mrb[24].mxu1 %v7198_v33 }
 0x1de   :  { %6126 = vmatpush1.bf16.msra.mxu1 %v6125_v59  ;;  %6080 = vmatprep.subr.bf16.mxu0 %v6079_v4 }
 0x1df   :  { %6128 = vmatprep.subr.bf16.mxu1 %v6127_v62  ;;  %4440 = vmatprep.mubr.f32.mxu0 %v8141_v9 }
 0x1e0   :  { %5130 = vmatprep.mubr.f32.mxu1 %v8141_v9  ;;  %4442 = vmatmul.mubr.f32.gmra.mrb[26].mxu0 %v7200_v34 }
 0x1e1   :  { %6082 = vmatpush1.bf16.msra.mxu0 %v6081_v44  ;;  %5132 = vmatmul.mubr.f32.gmra.mrb[26].mxu1 %v7200_v34 }
 0x1e2   :  { %6130 = vmatpush1.bf16.msra.mxu1 %v6129_v49  ;;  %6084 = vmatprep.subr.bf16.mxu0 %v7698_v18 }
 0x1e3   :  { %6132 = vmatprep.subr.bf16.mxu1 %v7706_v1  ;;  %4447 = vmatprep.mubr.f32.mxu0 %v8141_v9 }
 0x1e4   :  { %5137 = vmatprep.mubr.f32.mxu1 %v8141_v9  ;;  %4449 = vmatmul.mubr.f32.gmra.mrb[28].mxu0 %v7211_v3 }
 0x1e5   :  { %5139 = vmatmul.mubr.f32.gmra.mrb[28].mxu1 %v7211_v3  ;;  %4454 = vmatprep.mubr.f32.mxu0 %v8141_v9 }
 0x1e6   :  { %5144 = vmatprep.mubr.f32.mxu1 %v8141_v9 }
 0x1e8   :  { %4456 = vmatmul.mubr.f32.gmra.mrb[30].mxu0 %v7213_v16 }
 0x1e9   :  { %5146 = vmatmul.mubr.f32.gmra.mrb[30].mxu1 %v7213_v16  ;;  %4542 = vmatprep.mubr.f32.mxu0 %v8141_v9 }
 0x1ea   :  { %5232 = vmatprep.mubr.f32.mxu1 %v8141_v9 }
 0x1ec   :  { %4545 = vmatmul.mubr.f32.vlgmr.msra.gmra.mrb[24].mxu0 %v7206_v50 }
 0x1ed   :  { %6086 = vmatpush1.bf16.msra.mxu0 %v7712_v35  ;;  %5235 = vmatmul.mubr.f32.vlgmr.msra.gmra.mrb[24].mxu1 %v7206_v50 }
 0x1ee   :  { %6134 = vmatpush1.bf16.msra.mxu1 %v7720_v20  ;;  %6088 = vmatprep.subr.bf16.mxu0 %v7747_v2 }
 0x1ef   :  { %6136 = vmatprep.subr.bf16.mxu1 %v7752_v57  ;;  %4550 = vmatprep.mubr.f32.mxu0 %v8141_v9 }
 0x1f0   :  { %5240 = vmatprep.mubr.f32.mxu1 %v8141_v9  ;;  %4553 = vmatmul.mubr.f32.gmra.mrb[26].mxu0 %v7209_v51 }
 0x1f1   :  { %6090 = vmatpush1.bf16.msra.mxu0 %v7728_v54  ;;  %5243 = vmatmul.mubr.f32.gmra.mrb[26].mxu1 %v7209_v51 }
 0x1f2   :  { %6138 = vmatpush1.bf16.msra.mxu1 %v7732_v38  ;;  %6092 = vmatprep.subr.bf16.mxu0 %v6091_v53 }
 0x1f3   :  { %6140 = vmatprep.subr.bf16.mxu1 %v6139_v55  ;;  %4558 = vmatprep.mubr.f32.mxu0 %v8141_v9 }
 0x1f4   :  { %5248 = vmatprep.mubr.f32.mxu1 %v8141_v9  ;;  %4561 = vmatmul.mubr.f32.gmra.mrb[28].mxu0 %v7222_v15 }
 0x1f5   :  { %5251 = vmatmul.mubr.f32.gmra.mrb[28].mxu1 %v7222_v15  ;;  %4566 = vmatprep.mubr.f32.mxu0 %v8141_v9 }
 0x1f6   :  { %5256 = vmatprep.mubr.f32.mxu1 %v8141_v9 }
 0x1f8   :  { %4569 = vmatmul.mubr.f32.gmra.mrb[30].mxu0 %v7225_v19 }
 0x1f9   :  { %5259 = vmatmul.mubr.f32.gmra.mrb[30].mxu1 %v7225_v19  ;;  %4647 = vmatprep.mubr.f32.mxu0 %v8141_v9 }
 0x1fa   :  { %5337 = vmatprep.mubr.f32.mxu1 %v8141_v9 }
 0x1fc   :  { %4651 = vmatmul.mubr.f32.vlgmr.msra.gmra.mrb[24].mxu0 %v7216_v13 }
 0x1fd   :  { %6094 = vmatpush1.bf16.msra.mxu0 %v7837_v63  ;;  %5341 = vmatmul.mubr.f32.vlgmr.msra.gmra.mrb[24].mxu1 %v7216_v13 }
 0x1fe   :  { %6142 = vmatpush1.bf16.msra.mxu1 %v7843_v60  ;;  %6096 = vmatprep.subr.bf16.mxu0 %v7847_v22 }
 0x1ff   :  { %6144 = vmatprep.subr.bf16.mxu1 %v7850_v17  ;;  %4656 = vmatprep.mubr.f32.mxu0 %v8141_v9 }
 0x200   :  { %5346 = vmatprep.mubr.f32.mxu1 %v8141_v9  ;;  %4660 = vmatmul.mubr.f32.gmra.mrb[26].mxu0 %v7219_v14 }
 0x201   :  { %6098 = vmatpush1.bf16.msra.mxu0 %v7856_v32  ;;  %5350 = vmatmul.mubr.f32.gmra.mrb[26].mxu1 %v7219_v14 }
 0x202   :  { %6146 = vmatpush1.bf16.msra.mxu1 %v7862_v30  ;;  %6100 = vmatprep.subr.bf16.mxu0 %v7698_v18 }
 0x203   :  { %6148 = vmatprep.subr.bf16.mxu1 %v7706_v1  ;;  %4665 = vmatprep.mubr.f32.mxu0 %v8141_v9 }
 0x204   :  { %5355 = vmatprep.mubr.f32.mxu1 %v8141_v9  ;;  %4669 = vmatmul.mubr.f32.gmra.mrb[28].mxu0 %v7234_v21 }
 0x205   :  { %5359 = vmatmul.mubr.f32.gmra.mrb[28].mxu1 %v7234_v21  ;;  %4674 = vmatprep.mubr.f32.mxu0 %v8141_v9 }
 0x206   :  { %5364 = vmatprep.mubr.f32.mxu1 %v8141_v9 }
 0x208   :  { %4678 = vmatmul.mubr.f32.gmra.mrb[30].mxu0 %v7238_v43 }
 0x209   :  { %5368 = vmatmul.mubr.f32.gmra.mrb[30].mxu1 %v7238_v43  ;;  %4772 = vmatprep.mubr.f32.mxu0 %v8141_v9 }
 0x20a   :  { %5462 = vmatprep.mubr.f32.mxu1 %v8141_v9 }
 0x20c   :  { %4774 = vmatmul.mubr.f32.vlgmr.msra.gmra.mrb[24].mxu0 %v7198_v33 }
 0x20d   :  { %6102 = vmatpush1.bf16.msra.mxu0 %v7712_v35  ;;  %5464 = vmatmul.mubr.f32.vlgmr.msra.gmra.mrb[24].mxu1 %v7198_v33 }
 0x20e   :  { %6150 = vmatpush1.bf16.msra.mxu1 %v7720_v20  ;;  %6104 = vmatprep.subr.bf16.mxu0 %v7747_v2 }
 0x20f   :  { %6152 = vmatprep.subr.bf16.mxu1 %v7752_v57  ;;  %4779 = vmatprep.mubr.f32.mxu0 %v8141_v9 }
 0x210   :  { %5469 = vmatprep.mubr.f32.mxu1 %v8141_v9  ;;  %4781 = vmatmul.mubr.f32.gmra.mrb[26].mxu0 %v7200_v34 }
 0x211   :  { %6106 = vmatpush1.bf16.msra.mxu0 %v7728_v54  ;;  %5471 = vmatmul.mubr.f32.gmra.mrb[26].mxu1 %v7200_v34 }
 0x212   :  { %6154 = vmatpush1.bf16.msra.mxu1 %v7732_v38  ;;  %4786 = vmatprep.mubr.f32.mxu0 %v8141_v9 }
 0x213   :  { %5476 = vmatprep.mubr.f32.mxu1 %v8141_v9 }
 0x214   :  { %4788 = vmatmul.mubr.f32.gmra.mrb[28].mxu0 %v7211_v3 }
 0x215   :  { %5478 = vmatmul.mubr.f32.gmra.mrb[28].mxu1 %v7211_v3  ;;  %4793 = vmatprep.mubr.f32.mxu0 %v8141_v9 }
 0x216   :  { %5483 = vmatprep.mubr.f32.mxu1 %v8141_v9 }
 0x218   :  { %4795 = vmatmul.mubr.f32.gmra.mrb[30].mxu0 %v7213_v16 }
 0x219   :  { %5485 = vmatmul.mubr.f32.gmra.mrb[30].mxu1 %v7213_v16  ;;  %4873 = vmatprep.mubr.f32.mxu0 %v8141_v9 }
 0x21a   :  { %5563 = vmatprep.mubr.f32.mxu1 %v8141_v9 }
 0x21c   :  { %4875 = vmatmul.mubr.f32.vlgmr.msra.gmra.mrb[24].mxu0 %v7198_v33 }
 0x21d   :  { %5565 = vmatmul.mubr.f32.vlgmr.msra.gmra.mrb[24].mxu1 %v7198_v33  ;;  %4880 = vmatprep.mubr.f32.mxu0 %v8141_v9  ;;  %v7973_v33 = vpop.permute.xlu0 %2801 }
 0x21e   :  { %5570 = vmatprep.mubr.f32.mxu1 %v8141_v9 }
 0x220   :  { %4882 = vmatmul.mubr.f32.gmra.mrb[26].mxu0 %v7200_v34 }
 0x221   :  { %5572 = vmatmul.mubr.f32.gmra.mrb[26].mxu1 %v7200_v34  ;;  %4887 = vmatprep.mubr.f32.mxu0 %v8141_v9  ;;  %v7975_v50 = vpop.permute.xlu0 %2811  ;;  %v7977_v34 = vpop.permute.xlu1 %2806 }
 0x222   :  { %5577 = vmatprep.mubr.f32.mxu1 %v8141_v9 }
 0x224   :  { %4889 = vmatmul.mubr.f32.gmra.mrb[28].mxu0 %v7211_v3 }
 0x225   :  { %5579 = vmatmul.mubr.f32.gmra.mrb[28].mxu1 %v7211_v3  ;;  %4894 = vmatprep.mubr.f32.mxu0 %v8141_v9  ;;  %v7983_v52 = vpop.permute.xlu0 %5694 }
 0x226   :  { %5584 = vmatprep.mubr.f32.mxu1 %v8141_v9  ;;  %v7985_v9 = vpop.permute.xlu1 %2816 }
 0x228   :  { %4896 = vmatmul.mubr.f32.gmra.mrb[30].mxu0 %v7213_v16 }
 0x229   :  { %5586 = vmatmul.mubr.f32.gmra.mrb[30].mxu1 %v7213_v16  ;;  %v8002_v60 = vpop.permute.xlu0 %5704 }
 0x22a   :  { %v7996_v42 = vpop.permute.xlu1 %5699 }
 0x28f   :  { %v3496_v51 = vpop.f32.mrb[16].mxu0  ;;  %v4186_v14 = vpop.f32.mrb[16].mxu1 }
 0x290   :  { %v6187_v13 = vadd.f32 %v3496_v51, %v7973_v33  ;;  %v3498_v15 = vpop.f32.mrb[17].mxu0  ;;  %v6195_v3 = vadd.f32 %v4186_v14, %v7973_v33  ;;  %v4188_v21 = vpop.f32.mrb[17].mxu1 }
 0x291   :  { %v6188_v19 = vadd.f32 %v3498_v15, %v7973_v33  ;;  %v6196_v16 = vadd.f32 %v4188_v21, %v7973_v33 }
 0x292   :  { %vm5592_vm5 = vcmp.gt.f32.partialorder %v6187_v13, 0.0  ;;  %v5624_v43 = vmul.f32 0.2, %v6187_v13  ;;  %vm5594_vm6 = vcmp.gt.f32.partialorder %v6195_v3, 0.0  ;;  %v5626_v5 = vmul.f32 0.2, %v6195_v3 }
 0x293   :  { %vm5593_vm7 = vcmp.gt.f32.partialorder %v6188_v19, 0.0  ;;  %v5625_v40 = vmul.f32 0.2, %v6188_v19  ;;  %vm5595_vm8 = vcmp.gt.f32.partialorder %v6196_v16, 0.0  ;;  %v5627_v0 = vmul.f32 0.2, %v6196_v16 }
 0x294   :  { %v5656_v27 = vsel %vm5592_vm5, %v6187_v13, %v5624_v43  ;;  %v3503_v47 = vpop.f32.mrb[18].mxu0  ;;  %v4193_v56 = vpop.f32.mrb[18].mxu1  ;;  %v5658_v18 = vsel %vm5594_vm6, %v6195_v3, %v5626_v5 }
 0x295   :  { %v5712_v23 = vmul.f32 %v7983_v52, %v5656_v27  ;;  %v5657_v36 = vsel %vm5593_vm7, %v6188_v19, %v5625_v40  ;;  %v6189_v1 = vadd.f32 %v3503_v47, %v7977_v34  ;;  %v3505_v35 = vpop.f32.mrb[19].mxu0  ;;  %v4195_v20 = vpop.f32.mrb[19].mxu1  ;;  %v5714_v46 = vmul.f32 %v7983_v52, %v5658_v18 }
 0x296   :  { %v5713_v24 = vmul.f32 %v7983_v52, %v5657_v36  ;;  %v5659_v54 = vsel %vm5595_vm8, %v6196_v16, %v5627_v0  ;;  %v6197_v38 = vadd.f32 %v4193_v56, %v7977_v34  ;;  %v6190_v61 = vadd.f32 %v3505_v35, %v7977_v34  ;;  %v8011_v56 = vpop.permute.xlu1 %5709 }
 0x297   :  { %v5715_v2 = vmul.f32 %v7983_v52, %v5659_v54  ;;  %vm5600_vm9 = vcmp.gt.f32.partialorder %v6189_v1, 0.0  ;;  %v5632_v57 = vmul.f32 0.2, %v6189_v1  ;;  %v3510_v58 = vpop.f32.mrb[20].mxu0  ;;  %v6198_v48 = vadd.f32 %v4195_v20, %v7977_v34  ;;  %v4200_v37 = vpop.f32.mrb[20].mxu1 }
 0x298   :  { %vm5602_vm10 = vcmp.gt.f32.partialorder %v6197_v38, 0.0  ;;  %v5634_v25 = vmul.f32 0.2, %v6197_v38  ;;  %v6191_v41 = vadd.f32 %v3510_v58, %v7975_v50  ;;  %v3512_v28 = vpop.f32.mrb[21].mxu0  ;;  %vm5601_vm11 = vcmp.gt.f32.partialorder %v6190_v61, 0.0  ;;  %v4202_v62 = vpop.f32.mrb[21].mxu1 }
 0x299   :  { %v5664_v59 = vsel %vm5600_vm9, %v6189_v1, %v5632_v57  ;;  %v5633_v4 = vmul.f32 0.2, %v6190_v61  ;;  %v6199_v7 = vadd.f32 %v4200_v37, %v7975_v50  ;;  %vm5603_vm12 = vcmp.gt.f32.partialorder %v6198_v48, 0.0 }
 0x29a   :  { %v5720_v44 = vmul.f32 %v7996_v42, %v5664_v59  ;;  %v5666_v49 = vsel %vm5602_vm10, %v6197_v38, %v5634_v25  ;;  %v5635_v31 = vmul.f32 0.2, %v6198_v48  ;;  %vm5608_vm13 = vcmp.gt.f32.partialorder %v6191_v41, 0.0 }
 0x29b   :  { %v5722_v53 = vmul.f32 %v7996_v42, %v5666_v49  ;;  %v5665_v39 = vsel %vm5601_vm11, %v6190_v61, %v5633_v4  ;;  %v5640_v45 = vmul.f32 0.2, %v6191_v41  ;;  %v3517_v55 = vpop.f32.mrb[22].mxu0  ;;  %vm5610_vm14 = vcmp.gt.f32.partialorder %v6199_v7, 0.0  ;;  %v4207_v26 = vpop.f32.mrb[22].mxu1 }
 0x29c   :  { %v5744_v6 = vadd.f32 %v5720_v44, %v5712_v23  ;;  %v5721_v12 = vmul.f32 %v7996_v42, %v5665_v39  ;;  %v5667_v63 = vsel %vm5603_vm12, %v6198_v48, %v5635_v31  ;;  %v3519_v8 = vpop.f32.mrb[23].mxu0  ;;  %v5642_v11 = vmul.f32 0.2, %v6199_v7  ;;  %v4209_v29 = vpop.f32.mrb[23].mxu1 }
 0x29d   :  { %v5762_v10 = vadd.f32 %v5722_v53, %v5714_v46  ;;  %v5723_v22 = vmul.f32 %v7996_v42, %v5667_v63  ;;  %v5672_v17 = vsel %vm5608_vm13, %v6191_v41, %v5640_v45  ;;  %v6192_v51 = vadd.f32 %v3512_v28, %v7975_v50 }
 0x29e   :  { %v5753_v32 = vadd.f32 %v5721_v12, %v5713_v24  ;;  %v5728_v30 = vmul.f32 %v8002_v60, %v5672_v17  ;;  %v6200_v13 = vadd.f32 %v4202_v62, %v7975_v50  ;;  %v5674_v15 = vsel %vm5610_vm14, %v6199_v7, %v5642_v11  ;;  %v5820_v12 = vpop.permute.xlu0 %5819  ;;  %v8173_v11 = vld [vmem:[#allocation7_spill] sm:$0xff] }
 0x29f   :  { %v5771_v14 = vadd.f32 %v5723_v22, %v5715_v2  ;;  %v6193_v3 = vadd.f32 %v3517_v55, %v7985_v9  ;;  %v6201_v19 = vadd.f32 %v4207_v26, %v7985_v9  ;;  %v5730_v43 = vmul.f32 %v8002_v60, %v5674_v15 }
 0x2a0   :  { %v5745_v21 = vadd.f32 %v5744_v6, %v5728_v30  ;;  %vm5609_vm15 = vcmp.gt.f32.partialorder %v6192_v51, 0.0  ;;  %v5641_v16 = vmul.f32 0.2, %v6192_v51  ;;  %vm5611_vm0 = vcmp.gt.f32.partialorder %v6200_v13, 0.0 }
 0x2a1   :  { %v5643_v5 = vmul.f32 0.2, %v6200_v13  ;;  %vm5616_vm1 = vcmp.gt.f32.partialorder %v6193_v3, 0.0  ;;  %v5648_v40 = vmul.f32 0.2, %v6193_v3  ;;  %v5763_v27 = vadd.f32 %v5762_v10, %v5730_v43 }
 0x2a2   :  { %v5673_v0 = vsel %vm5609_vm15, %v6192_v51, %v5641_v16  ;;  %vm5618_vm2 = vcmp.gt.f32.partialorder %v6201_v19, 0.0  ;;  %v5650_v47 = vmul.f32 0.2, %v6201_v19  ;;  %v6194_v1 = vadd.f32 %v3519_v8, %v7985_v9 }
 0x2a3   :  { %v5729_v23 = vmul.f32 %v8002_v60, %v5673_v0  ;;  %v5675_v18 = vsel %vm5611_vm0, %v6200_v13, %v5643_v5  ;;  %v5680_v36 = vsel %vm5616_vm1, %v6193_v3, %v5648_v40  ;;  %v6202_v24 = vadd.f32 %v4209_v29, %v7985_v9 }
 0x2a4   :  { %v5731_v35 = vmul.f32 %v8002_v60, %v5675_v18  ;;  %v5736_v20 = vmul.f32 %v8011_v56, %v5680_v36  ;;  %v5682_v46 = vsel %vm5618_vm2, %v6201_v19, %v5650_v47  ;;  %vm5617_vm3 = vcmp.gt.f32.partialorder %v6194_v1, 0.0 }
 0x2a5   :  { %v5754_v54 = vadd.f32 %v5753_v32, %v5729_v23  ;;  %v5738_v38 = vmul.f32 %v8011_v56, %v5682_v46  ;;  %v5649_v2 = vmul.f32 0.2, %v6194_v1  ;;  %vm5619_vm4 = vcmp.gt.f32.partialorder %v6202_v24, 0.0 }
 0x2a6   :  { %v5772_v57 = vadd.f32 %v5771_v14, %v5731_v35  ;;  %v5746_v61 = vadd.f32 %v5745_v21, %v5736_v20  ;;  %v5651_v58 = vmul.f32 0.2, %v6202_v24  ;;  %v8022_v29 = vrot.slane %v5820_v12, %v8173_v11 }
 0x2a7   :  { %v5764_v25 = vadd.f32 %v5763_v27, %v5738_v38  ;;  %v5681_v48 = vsel %vm5617_vm3, %v6194_v1, %v5649_v2 }
 0x2a8   :  { %v5747_v41 = vrot.slane %v5746_v61, 4  ;;  %v5737_v37 = vmul.f32 %v8011_v56, %v5681_v48  ;;  %v5683_v28 = vsel %vm5619_vm4, %v6202_v24, %v5651_v58  ;;  %v8174_v58 = vld [vmem:[#allocation6_spill] sm:$0xff] }
 0x2a9   :  { %v5765_v59 = vrot.slane %v5764_v25, 4  ;;  %v5739_v4 = vmul.f32 %v8011_v56, %v5683_v28 }
 0x2aa   :  { %v5748_v7 = vadd.f32 %v5747_v41, %v5746_v61  ;;  %v5755_v62 = vadd.f32 %v5754_v54, %v5737_v37  ;;  %v6615_v54 = vmov 1966171168  }
 0x2ab   :  { %v5766_v44 = vadd.f32 %v5765_v59, %v5764_v25  ;;  %v5773_v49 = vadd.f32 %v5772_v57, %v5739_v4  ;;  %v5895_v38 = vunpack.c.l.s4 %v6615_v54 }
 0x2ac   :  { %v5749_v31 = vrot.slane %v5748_v7, 2  ;;  %v5756_v53 = vrot.slane %v5755_v62, 4 }
 0x2ad   :  { %v5767_v39 = vrot.slane %v5766_v44, 2  ;;  %v5774_v45 = vrot.slane %v5773_v49, 4  ;;  %v5896_v2 = vunpack.c.0.s8 %v5895_v38 }
 0x2ae   :  { %v5750_v55 = vadd.f32 %v5749_v31, %v5748_v7  ;;  %v5757_v6 = vadd.f32 %v5756_v53, %v5755_v62 }
 0x2af   :  { %v5768_v63 = vadd.f32 %v5767_v39, %v5766_v44  ;;  %v5775_v26 = vadd.f32 %v5774_v45, %v5773_v49  ;;  %v8029_v25 = vsub.s32 %v5896_v2, %v8174_v58 }
 0x2b0   :  { %v5751_v8 = vrot.slane %v5750_v55, 1  ;;  %v5758_v10 = vrot.slane %v5757_v6, 2 }
 0x2b1   :  { %v5769_v22 = vrot.slane %v5768_v63, 1  ;;  %v5776_v17 = vrot.slane %v5775_v26, 2 }
 0x2b2   :  { %v5752_v32 = vadd.f32 %v5751_v8, %v5750_v55  ;;  %v5759_v30 = vadd.f32 %v5758_v10, %v5757_v6 }
 0x2b3   :  { %v5770_v51 = vadd.f32 %v5769_v22, %v5768_v63  ;;  %v5777_v13 = vadd.f32 %v5776_v17, %v5775_v26 }
 0x2b4   :  { %v5826_v14 = vadd.f32 %v8022_v29, %v5752_v32  ;;  %v5760_v15 = vrot.slane %v5759_v30, 1 }
 0x2b5   :  { %v5828_v3 = vadd.f32 %v8022_v29, %v5770_v51  ;;  %v5778_v19 = vrot.slane %v5777_v13, 1 }
 0x2b6   :  { %v5955_v21 = vmul.f32 -1.442695, %v5826_v14  ;;  %v5761_v43 = vadd.f32 %v5760_v15, %v5759_v30 }
 0x2b7   :  { %v5957_v16 = vmul.f32 -1.442695, %v5828_v3  ;;  %v5779_v5 = vadd.f32 %v5778_v19, %v5777_v13 }
 0x2b8   :  { %6556 = vpow2.f32 %v5955_v21  ;;  %v5827_v40 = vadd.f32 %v8022_v29, %v5761_v43 }
 0x2b9   :  { %6558 = vpow2.f32 %v5957_v16  ;;  %v5829_v27 = vadd.f32 %v8022_v29, %v5779_v5 }
 0x2ba   :  { %v5956_v0 = vmul.f32 -1.442695, %v5827_v40 }
 0x2bb   :  { %v5958_v47 = vmul.f32 -1.442695, %v5829_v27 }
 0x2bc   :  { %6560 = vpow2.f32 %v5956_v0 }
 0x2bd   :  { %6562 = vpow2.f32 %v5958_v47 }
 0x2c2   :  { %v6557_v23 = vpop.eup %6556 }
 0x2c3   :  { %v6559_v18 = vpop.eup %6558  ;;  %v5858_v36 = vadd.f32 1.0, %v6557_v23 }
 0x2c4   :  { %v5860_v1 = vadd.f32 1.0, %v6559_v18 }
 0x2c5   :  { %6564 = vrcp.f32 %v5858_v36 }
 0x2c6   :  { %v6561_v35 = vpop.eup %6560  ;;  %6566 = vrcp.f32 %v5860_v1 }
 0x2c7   :  { %v6563_v20 = vpop.eup %6562  ;;  %v5859_v46 = vadd.f32 1.0, %v6561_v35 }
 0x2c8   :  { %v5861_v24 = vadd.f32 1.0, %v6563_v20 }
 0x2c9   :  { %6568 = vrcp.f32 %v5859_v46 }
 0x2ca   :  { %6570 = vrcp.f32 %v5861_v24 }
 0x2cf   :  { %v6565_v57 = vpop.eup %6564 }
 0x2d0   :  { %v6567_v61 = vpop.eup %6566 }
 0x2d3   :  { %v6569_v48 = vpop.eup %6568 }
 0x2d4   :  { %v6571_v41 = vpop.eup %6570  ;;  %v5890_v37 = vcombine.low %v6565_v57, %v6569_v48 }
 0x2d5   :  { %v5891_v28 = vcombine.low %v6567_v61, %v6571_v41 }
 0x2d6   :  { %v8032_v59 = vrot.slane %v5890_v37, %v8029_v25 }
 0x2d7   :  { %v8035_v4 = vrot.slane %v5891_v28, %v8029_v25 }
 0x2d9   :  { %v5922_v7 = vcombine.low %v8032_v59, %v8035_v4 }
 0x2ef   :  { %v4876_v62 = vpop.f32.mrb[24].mxu0 }
 0x2f0   :  { %v6203_v44 = vadd.f32 %v4876_v62, %v7973_v33  ;;  %v5566_v49 = vpop.f32.mrb[24].mxu1  ;;  %v4878_v31 = vpop.f32.mrb[25].mxu0 }
 0x2f1   :  { %v6211_v53 = vadd.f32 %v5566_v49, %v7973_v33  ;;  %v6204_v39 = vadd.f32 %v4878_v31, %v7973_v33  ;;  %v5568_v45 = vpop.f32.mrb[25].mxu1 }
 0x2f2   :  { %vm5596_vm5 = vcmp.gt.f32.partialorder %v6203_v44, 0.0  ;;  %v5628_v55 = vmul.f32 0.2, %v6203_v44  ;;  %v6212_v6 = vadd.f32 %v5568_v45, %v7973_v33 }
 0x2f3   :  { %vm5598_vm6 = vcmp.gt.f32.partialorder %v6211_v53, 0.0  ;;  %v5630_v12 = vmul.f32 0.2, %v6211_v53  ;;  %vm5597_vm7 = vcmp.gt.f32.partialorder %v6204_v39, 0.0  ;;  %v5629_v63 = vmul.f32 0.2, %v6204_v39 }
 0x2f4   :  { %v5660_v26 = vsel %vm5596_vm5, %v6203_v44, %v5628_v55  ;;  %vm5599_vm8 = vcmp.gt.f32.partialorder %v6212_v6, 0.0  ;;  %v5631_v8 = vmul.f32 0.2, %v6212_v6  ;;  %v4883_v10 = vpop.f32.mrb[26].mxu0  ;;  %v5573_v22 = vpop.f32.mrb[26].mxu1 }
 0x2f5   :  { %v5716_v17 = vmul.f32 %v7983_v52, %v5660_v26  ;;  %v5662_v11 = vsel %vm5598_vm6, %v6211_v53, %v5630_v12  ;;  %v5661_v32 = vsel %vm5597_vm7, %v6204_v39, %v5629_v63  ;;  %v6205_v30 = vadd.f32 %v4883_v10, %v7977_v34  ;;  %v4885_v51 = vpop.f32.mrb[27].mxu0  ;;  %v5575_v13 = vpop.f32.mrb[27].mxu1 }
 0x2f6   :  { %v5718_v14 = vmul.f32 %v7983_v52, %v5662_v11  ;;  %v5717_v33 = vmul.f32 %v7983_v52, %v5661_v32  ;;  %v5663_v15 = vsel %vm5599_vm8, %v6212_v6, %v5631_v8  ;;  %v6213_v3 = vadd.f32 %v5573_v22, %v7977_v34 }
 0x2f7   :  { %v5719_v19 = vmul.f32 %v7983_v52, %v5663_v15  ;;  %vm5604_vm9 = vcmp.gt.f32.partialorder %v6205_v30, 0.0  ;;  %v5636_v21 = vmul.f32 0.2, %v6205_v30  ;;  %v6206_v43 = vadd.f32 %v4885_v51, %v7977_v34  ;;  %v4890_v16 = vpop.f32.mrb[28].mxu0 }
 0x2f8   :  { %vm5606_vm10 = vcmp.gt.f32.partialorder %v6213_v3, 0.0  ;;  %v5638_v5 = vmul.f32 0.2, %v6213_v3  ;;  %v6214_v40 = vadd.f32 %v5575_v13, %v7977_v34  ;;  %v6207_v27 = vadd.f32 %v4890_v16, %v7975_v50  ;;  %v5580_v0 = vpop.f32.mrb[28].mxu1  ;;  %v4892_v47 = vpop.f32.mrb[29].mxu0 }
 0x2f9   :  { %v5668_v23 = vsel %vm5604_vm9, %v6205_v30, %v5636_v21  ;;  %vm5605_vm11 = vcmp.gt.f32.partialorder %v6206_v43, 0.0  ;;  %v5637_v18 = vmul.f32 0.2, %v6206_v43  ;;  %v6215_v36 = vadd.f32 %v5580_v0, %v7975_v50  ;;  %v5582_v1 = vpop.f32.mrb[29].mxu1 }
 0x2fa   :  { %v5724_v52 = vmul.f32 %v7996_v42, %v5668_v23  ;;  %v5670_v35 = vsel %vm5606_vm10, %v6213_v3, %v5638_v5  ;;  %vm5607_vm12 = vcmp.gt.f32.partialorder %v6214_v40, 0.0  ;;  %v5639_v20 = vmul.f32 0.2, %v6214_v40 }
 0x2fb   :  { %v5726_v46 = vmul.f32 %v7996_v42, %v5670_v35  ;;  %v5669_v24 = vsel %vm5605_vm11, %v6206_v43, %v5637_v18  ;;  %vm5612_vm13 = vcmp.gt.f32.partialorder %v6207_v27, 0.0  ;;  %v5644_v34 = vmul.f32 0.2, %v6207_v27  ;;  %v4897_v54 = vpop.f32.mrb[30].mxu0 }
 0x2fc   :  { %v5780_v38 = vadd.f32 %v5724_v52, %v5716_v17  ;;  %v5725_v2 = vmul.f32 %v7996_v42, %v5669_v24  ;;  %v5671_v57 = vsel %vm5607_vm12, %v6214_v40, %v5639_v20  ;;  %vm5614_vm14 = vcmp.gt.f32.partialorder %v6215_v36, 0.0  ;;  %v5587_v61 = vpop.f32.mrb[30].mxu1  ;;  %v4899_v58 = vpop.f32.mrb[31].mxu0 }
 0x2fd   :  { %v5798_v48 = vadd.f32 %v5726_v46, %v5718_v14  ;;  %v5727_v41 = vmul.f32 %v7996_v42, %v5671_v57  ;;  %v5676_v37 = vsel %vm5612_vm13, %v6207_v27, %v5644_v34  ;;  %v5646_v28 = vmul.f32 0.2, %v6215_v36  ;;  %v5589_v62 = vpop.f32.mrb[31].mxu1 }
 0x2fe   :  { %v5789_v44 = vadd.f32 %v5725_v2, %v5717_v33  ;;  %v5732_v49 = vmul.f32 %v8002_v60, %v5676_v37  ;;  %v6208_v31 = vadd.f32 %v4892_v47, %v7975_v50  ;;  %v6216_v53 = vadd.f32 %v5582_v1, %v7975_v50 }
 0x2ff   :  { %v5807_v39 = vadd.f32 %v5727_v41, %v5719_v19  ;;  %v5678_v45 = vsel %vm5614_vm14, %v6215_v36, %v5646_v28  ;;  %v6209_v55 = vadd.f32 %v4897_v54, %v7985_v9  ;;  %v6217_v6 = vadd.f32 %v5587_v61, %v7985_v9 }
 0x300   :  { %v5781_v12 = vadd.f32 %v5780_v38, %v5732_v49  ;;  %v5734_v63 = vmul.f32 %v8002_v60, %v5678_v45  ;;  %vm5613_vm15 = vcmp.gt.f32.partialorder %v6208_v31, 0.0  ;;  %v5645_v42 = vmul.f32 0.2, %v6208_v31 }
 0x301   :  { %vm5615_vm0 = vcmp.gt.f32.partialorder %v6216_v53, 0.0  ;;  %v5647_v26 = vmul.f32 0.2, %v6216_v53  ;;  %vm5620_vm1 = vcmp.gt.f32.partialorder %v6209_v55, 0.0  ;;  %v5652_v8 = vmul.f32 0.2, %v6209_v55 }
 0x302   :  { %v5799_v10 = vadd.f32 %v5798_v48, %v5734_v63  ;;  %v5677_v22 = vsel %vm5613_vm15, %v6208_v31, %v5645_v42  ;;  %vm5622_vm2 = vcmp.gt.f32.partialorder %v6217_v6, 0.0  ;;  %v5654_v17 = vmul.f32 0.2, %v6217_v6 }
 0x303   :  { %v5733_v50 = vmul.f32 %v8002_v60, %v5677_v22  ;;  %v5679_v11 = vsel %vm5615_vm0, %v6216_v53, %v5647_v26  ;;  %v5684_v32 = vsel %vm5620_vm1, %v6209_v55, %v5652_v8  ;;  %v6210_v30 = vadd.f32 %v4899_v58, %v7985_v9 }
 0x304   :  { %v5735_v51 = vmul.f32 %v8002_v60, %v5679_v11  ;;  %v5740_v13 = vmul.f32 %v8011_v56, %v5684_v32  ;;  %v5686_v14 = vsel %vm5622_vm2, %v6217_v6, %v5654_v17  ;;  %v6218_v33 = vadd.f32 %v5589_v62, %v7985_v9 }
 0x305   :  { %v5790_v15 = vadd.f32 %v5789_v44, %v5733_v50  ;;  %v5742_v3 = vmul.f32 %v8011_v56, %v5686_v14  ;;  %vm5621_vm3 = vcmp.gt.f32.partialorder %v6210_v30, 0.0  ;;  %v5653_v19 = vmul.f32 0.2, %v6210_v30 }
 0x306   :  { %v5808_v21 = vadd.f32 %v5807_v39, %v5735_v51  ;;  %v5782_v43 = vadd.f32 %v5781_v12, %v5740_v13  ;;  %vm5623_vm4 = vcmp.gt.f32.partialorder %v6218_v33, 0.0  ;;  %v5655_v16 = vmul.f32 0.2, %v6218_v33 }
 0x307   :  { %v5800_v5 = vadd.f32 %v5799_v10, %v5742_v3  ;;  %v5685_v40 = vsel %vm5621_vm3, %v6210_v30, %v5653_v19  ;;  %v5930_v19 = vrot.slane %v5922_v7, %v8029_v25 }
 0x308   :  { %v5783_v27 = vrot.slane %v5782_v43, 4  ;;  %v5741_v0 = vmul.f32 %v8011_v56, %v5685_v40  ;;  %v5687_v60 = vsel %vm5623_vm4, %v6218_v33, %v5655_v16 }
 0x309   :  { %v5801_v47 = vrot.slane %v5800_v5, 4  ;;  %v5743_v23 = vmul.f32 %v8011_v56, %v5687_v60 }
 0x30a   :  { %v5784_v18 = vadd.f32 %v5783_v27, %v5782_v43  ;;  %v5791_v9 = vadd.f32 %v5790_v15, %v5741_v0 }
 0x30b   :  { %v5802_v36 = vadd.f32 %v5801_v47, %v5800_v5  ;;  %v5809_v1 = vadd.f32 %v5808_v21, %v5743_v23 }
 0x30c   :  { %v5785_v52 = vrot.slane %v5784_v18, 2  ;;  %v5792_v35 = vrot.slane %v5791_v9, 4 }
 0x30d   :  { %v5803_v20 = vrot.slane %v5802_v36, 2  ;;  %v5810_v46 = vrot.slane %v5809_v1, 4 }
 0x30e   :  { %v5786_v24 = vadd.f32 %v5785_v52, %v5784_v18  ;;  %v5793_v34 = vadd.f32 %v5792_v35, %v5791_v9 }
 0x30f   :  { %v5804_v54 = vadd.f32 %v5803_v20, %v5802_v36  ;;  %v5811_v38 = vadd.f32 %v5810_v46, %v5809_v1 }
 0x310   :  { %v5787_v2 = vrot.slane %v5786_v24, 1  ;;  %v5794_v57 = vrot.slane %v5793_v34, 2 }
 0x311   :  { %v5805_v61 = vrot.slane %v5804_v54, 1  ;;  %v5812_v58 = vrot.slane %v5811_v38, 2 }
 0x312   :  { %v5788_v48 = vadd.f32 %v5787_v2, %v5786_v24  ;;  %v5795_v41 = vadd.f32 %v5794_v57, %v5793_v34 }
 0x313   :  { %v5806_v37 = vadd.f32 %v5805_v61, %v5804_v54  ;;  %v5813_v56 = vadd.f32 %v5812_v58, %v5811_v38 }
 0x314   :  { %v5830_v28 = vadd.f32 %v8022_v29, %v5788_v48  ;;  %v5796_v62 = vrot.slane %v5795_v41, 1 }
 0x315   :  { %v5832_v44 = vadd.f32 %v8022_v29, %v5806_v37  ;;  %v5814_v49 = vrot.slane %v5813_v56, 1 }
 0x316   :  { %v5959_v31 = vmul.f32 -1.442695, %v5830_v28  ;;  %v5797_v53 = vadd.f32 %v5796_v62, %v5795_v41 }
 0x317   :  { %v5961_v39 = vmul.f32 -1.442695, %v5832_v44  ;;  %v5815_v45 = vadd.f32 %v5814_v49, %v5813_v56 }
 0x318   :  { %6572 = vpow2.f32 %v5959_v31  ;;  %v5831_v55 = vadd.f32 %v8022_v29, %v5797_v53 }
 0x319   :  { %6574 = vpow2.f32 %v5961_v39  ;;  %v5833_v6 = vadd.f32 %v8022_v29, %v5815_v45 }
 0x31a   :  { %v5960_v12 = vmul.f32 -1.442695, %v5831_v55 }
 0x31b   :  { %v5962_v63 = vmul.f32 -1.442695, %v5833_v6 }
 0x31c   :  { %6576 = vpow2.f32 %v5960_v12 }
 0x31d   :  { %6578 = vpow2.f32 %v5962_v63 }
 0x322   :  { %v6573_v42 = vpop.eup %6572 }
 0x323   :  { %v6575_v26 = vpop.eup %6574  ;;  %v5862_v8 = vadd.f32 1.0, %v6573_v42 }
 0x324   :  { %v5864_v10 = vadd.f32 1.0, %v6575_v26 }
 0x325   :  { %6580 = vrcp.f32 %v5862_v8 }
 0x326   :  { %v6577_v22 = vpop.eup %6576  ;;  %6582 = vrcp.f32 %v5864_v10 }
 0x327   :  { %v6579_v17 = vpop.eup %6578  ;;  %v5863_v50 = vadd.f32 1.0, %v6577_v22 }
 0x328   :  { %v5865_v11 = vadd.f32 1.0, %v6579_v17 }
 0x329   :  { %6584 = vrcp.f32 %v5863_v50 }
 0x32a   :  { %6586 = vrcp.f32 %v5865_v11 }
 0x32f   :  { %v6581_v32 = vpop.eup %6580 }
 0x330   :  { %v6583_v30 = vpop.eup %6582 }
 0x333   :  { %v6585_v51 = vpop.eup %6584 }
 0x334   :  { %v6587_v29 = vpop.eup %6586  ;;  %v5892_v13 = vcombine.low %v6581_v32, %v6585_v51 }
 0x335   :  { %v5893_v14 = vcombine.low %v6583_v30, %v6587_v29 }
 0x336   :  { %v5914_v33 = vrot.slane %v5892_v13, %v8029_v25 }
 0x337   :  { %v5921_v15 = vrot.slane %v5893_v14, %v8029_v25 }
 0x339   :  { %v5923_v3 = vcombine.low %v5914_v33, %v5921_v15 }
 0x33b   :  { %v5937_v21 = vrot.slane %v5923_v3, %v8029_v25 }
 0x33d   :  { %v5938_v43 = vcombine.low %v5930_v19, %v5937_v21 }
 0x33f   :  { %5940 = vst [vmem:[#allocation3] sm:$0xff] %v5938_v43 }
 0x340   :  { %6599 = shalt.err (!%p6596_p4)
}
 0x341   :  { %s6600_s19 = scalar_lea.hbm %s8101_s7, 128 }
 0x342   :  { %p6601_p5 = scmp.ne.s32.totalorder %s8101_s7, %s6600_s19  ;;  %p6604_p6 = scmp.lt.u32.totalorder %s6600_s19, %s8101_s7 }
 0x344   :  { %p6606_p7 = pnand %p6604_p6, %p6601_p5 }
 0x346   :  { %6609 = shalt.err (!%p6606_p7)
}
 0x347   :  { %5950 = dma.vmem_to_hbm [thread:$0]  %s5948_s15, 128, %s8101_s7, [#allocation4]  }
 0x348   :  { %6610 = dma.done.wait [#allocation4], 128  }
 0x349   :  { %6611 = vsyncadd [#allocation4], 4294967168 }
 0x34a   :  { %5954 = vsyncpa [#allocation4], 1 }

</bundles_post_ra>
